<compile_context>
chip_gen: v6e
topology: v6e:2x2x1
jax: 0.10.0
libtpu: 0.0.40
codegen_flags: <defaults>
</compile_context>

<pallas_src>
import functools

import jax
import jax.numpy as jnp
from jax.experimental import pallas as pl
from jax.experimental.pallas import tpu as pltpu

IN_F = 28 * 28      # 784 : lane dim of the x block == full array dim -> (8,128) rule OK
HID = 512
OUT = 10
OUT_PAD = 128       # lane-dense output width; sliced back to 10 in the wrapper


def _mlp_kernel(x_ref, w1_ref, b1_ref, w2_ref, b2_ref, w3_ref, b3_ref, o_ref):
    # x arrives as f32 straight from HBM (no wrapper cast/pad pass); bf16 cast on the VPU.
    x = x_ref[...].astype(jnp.bfloat16)                                   # (TB, 784) bf16
    h1 = jnp.dot(x, w1_ref[...], preferred_element_type=jnp.float32)      # MXU -> f32
    h1 = jnp.maximum(h1 + b1_ref[...], 0.0)                               # bias + ReLU (VPU)
    h2 = jnp.dot(h1.astype(jnp.bfloat16), w2_ref[...],
                 preferred_element_type=jnp.float32)
    h2 = jnp.maximum(h2 + b2_ref[...], 0.0)
    logits = jnp.dot(h2.astype(jnp.bfloat16), w3_ref[...],
                     preferred_element_type=jnp.float32) + b3_ref[...]
    o_ref[...] = logits.astype(o_ref.dtype)                               # (TB, 128) bf16


def _choose_batch_tile(B: int) -> int:
    """Static (trace-time) batch-tile selection."""
    if B <= 128:
        # Small-batch latency: one tile covering the whole batch (block dim == full array
        # dim satisfies the (8,128) rule); no wasted rows, single grid step.
        return B
    # Large batch: biggest 128-aligned tile up to 512 that keeps >= 2 grid steps so the
    # "parallel" axis can feed both v7x TensorCores; bigger M amortizes per-step overhead
    # and MXU fill/drain on v5e/v6e as well.
    return min(512, max(128, (B // 2 // 128) * 128))


@functools.partial(jax.jit, static_argnames=("batch_tile",))
def mnist_forward(x_nchw, params, *, batch_tile=None):
    """x_nchw: (B, 1, 28, 28) float32. Returns logits (B, 10) float32."""
    w1, b1, w2, b2, w3, b3 = params
    B = x_nchw.shape[0]
    tb = batch_tile if batch_tile is not None else _choose_batch_tile(B)

    # nn.Flatten (row-major). Stays f32 -- this is just a metadata reshape, no HBM pass.
    x = x_nchw.reshape(B, IN_F)

    # Weights: bf16 MXU operands; W3/b3 zero-padded to a lane-dense 128-wide output.
    w1p = w1.astype(jnp.bfloat16)                                          # (784, 512)
    w2p = w2.astype(jnp.bfloat16)                                          # (512, 512)
    w3p = jnp.pad(w3, ((0, 0), (0, OUT_PAD - OUT))).astype(jnp.bfloat16)   # (512, 128)
    b1p = b1.astype(jnp.float32)                                           # (1, 512)
    b2p = b2.astype(jnp.float32)                                           # (1, 512)
    b3p = jnp.pad(b3, ((0, 0), (0, OUT_PAD - OUT))).astype(jnp.float32)    # (1, 128)

    n_steps = pl.cdiv(B, tb)
    grid = (n_steps,)
    full = lambda i: (0, 0)   # resident operands: constant index_map -> DMA'd once

    # Right-sized VMEM budget computed from the block shapes (double buffers included).
    weight_bytes = (IN_F * HID + HID * HID + HID * OUT_PAD) * 2 + (HID + HID + OUT_PAD) * 4
    vmem_needed = (
        2 * tb * IN_F * 4                                   # x window, f32, double-buffered
        + 2 * weight_bytes                                  # resident weights/biases (2 bufs)
        + 2 * tb * OUT_PAD * 2                              # logits window, bf16, 2 bufs
        + tb * (IN_F * 2 + 6 * HID * 4 + OUT_PAD * 4)       # in-kernel temporaries (estimate)
    )
    vmem_limit = max(16 * 1024 * 1024, vmem_needed + 4 * 1024 * 1024)

    flops = 2 * n_steps * tb * (IN_F * HID + HID * HID + HID * OUT_PAD)
    bytes_accessed = (
        B * IN_F * 4          # x read (f32, single pass)
        + weight_bytes        # weights (bf16) + biases (f32)
        + B * OUT_PAD * 2     # logits write (bf16)
    )

    out = pl.pallas_call(
        _mlp_kernel,
        out_shape=jax.ShapeDtypeStruct((B, OUT_PAD), jnp.bfloat16),
        grid_spec=pltpu.PrefetchScalarGridSpec(
            num_scalar_prefetch=0,
            grid=grid,
            in_specs=[
                pl.BlockSpec((tb, IN_F), lambda i: (i, 0)),   # x tile (f32, cast in-kernel)
                pl.BlockSpec((IN_F, HID), full),              # W1 (resident)
                pl.BlockSpec((1, HID), full),                 # b1
                pl.BlockSpec((HID, HID), full),               # W2
                pl.BlockSpec((1, HID), full),                 # b2
                pl.BlockSpec((HID, OUT_PAD), full),           # W3 (lane-dense padded)
                pl.BlockSpec((1, OUT_PAD), full),             # b3
            ],
            out_specs=pl.BlockSpec((tb, OUT_PAD), lambda i: (i, 0)),
        ),
        compiler_params=pltpu.CompilerParams(
            dimension_semantics=("parallel",),                # shards grid across TCs (v7x)
            vmem_limit_bytes=int(vmem_limit),
        ),
        cost_estimate=pl.CostEstimate(
            flops=flops, transcendentals=0, bytes_accessed=bytes_accessed),
    )(x, w1p, b1p, w2p, b2p, w3p, b3p)

    return out[:, :OUT].astype(jnp.float32)


def init_params(key):
    """Deterministic init matching the nn.Linear shapes (stored as (in, out))."""
    k1, k2, k3, k4, k5, k6 = jax.random.split(key, 6)

    def lin(kw, kb, fan_in, fan_out):
        bound = 1.0 / jnp.sqrt(fan_in)
        w = jax.random.uniform(kw, (fan_in, fan_out), jnp.float32, -bound, bound)
        b = jax.random.uniform(kb, (1, fan_out), jnp.float32, -bound, bound)
        return w, b

    w1, b1 = lin(k1, k2, IN_F, HID)
    w2, b2 = lin(k3, k4, HID, HID)
    w3, b3 = lin(k5, k6, HID, OUT)
    return (w1, b1, w2, b2, w3, b3)


def reference_forward_f32(x_nchw, params):
    w1, b1, w2, b2, w3, b3 = params
    x = x_nchw.reshape(x_nchw.shape[0], -1)
    h1 = jnp.maximum(x @ w1 + b1, 0.0)
    h2 = jnp.maximum(h1 @ w2 + b2, 0.0)
    return h2 @ w3 + b3


def reference_forward_bf16(x_nchw, params):
    """Mirrors the kernel's bf16-operand / f32-accumulation / bf16-output numerics."""
    w1, b1, w2, b2, w3, b3 = params
    x = x_nchw.reshape(x_nchw.shape[0], -1).astype(jnp.bfloat16)
    h1 = jnp.maximum(
        jnp.dot(x, w1.astype(jnp.bfloat16), preferred_element_type=jnp.float32) + b1, 0.0)
    h2 = jnp.maximum(
        jnp.dot(h1.astype(jnp.bfloat16), w2.astype(jnp.bfloat16),
                preferred_element_type=jnp.float32) + b2, 0.0)
    logits = jnp.dot(h2.astype(jnp.bfloat16), w3.astype(jnp.bfloat16),
                     preferred_element_type=jnp.float32) + b3
    return logits.astype(jnp.bfloat16).astype(jnp.float32)


if __name__ == "__main__":
    key = jax.random.PRNGKey(0)
    kx, kp = jax.random.split(key)
    params = init_params(kp)

    # Small batch: single tile covering the whole batch (tb == B), one grid step.
    B = 4
    x = jax.random.normal(kx, (B, 1, 28, 28), dtype=jnp.float32)
    logits = jax.block_until_ready(mnist_forward(x, params))
    assert logits.shape == (B, OUT)
    assert jnp.allclose(logits, reference_forward_bf16(x, params), atol=1e-2, rtol=1e-2), \
        "mismatch vs bf16 reference"
    assert jnp.allclose(logits, reference_forward_f32(x, params), atol=5e-2, rtol=5e-2), \
        "mismatch vs f32 reference"

    # Larger batch: tb=128, 2 parallel grid steps, second block partial (masked rows).
    B2 = 200
    x2 = jax.random.normal(kx, (B2, 1, 28, 28), dtype=jnp.float32)
    logits2 = jax.block_until_ready(mnist_forward(x2, params))
    assert logits2.shape == (B2, OUT)
    assert jnp.allclose(logits2, reference_forward_bf16(x2, params), atol=1e-2, rtol=1e-2), \
        "mismatch vs bf16 reference (multi-tile)"
    assert jnp.allclose(logits2, reference_forward_f32(x2, params), atol=5e-2, rtol=5e-2), \
        "mismatch vs f32 reference (multi-tile)"

    print("KERNEL_OK")
</pallas_src>

<mosaic_0001>
module attributes {stable_mosaic.version = 11 : i64} {
  func.func @_mlp_kernel(%arg0: i32, %arg1: memref<4x784xf32, #tpu.memory_space<vmem>>, %arg2: memref<784x512xbf16, #tpu.memory_space<vmem>>, %arg3: memref<1x512xf32, #tpu.memory_space<vmem>>, %arg4: memref<512x512xbf16, #tpu.memory_space<vmem>>, %arg5: memref<1x512xf32, #tpu.memory_space<vmem>>, %arg6: memref<512x128xbf16, #tpu.memory_space<vmem>>, %arg7: memref<1x128xf32, #tpu.memory_space<vmem>>, %arg8: memref<4x128xbf16, #tpu.memory_space<vmem>>) attributes {dimension_semantics = [#tpu.dimension_semantics<parallel>], iteration_bounds = array<i64: 1>, scalar_prefetch = 0 : i64, scratch_operands = 0 : i64, tpu.core_type = #tpu.core_type<tc>, window_params = [{transform_indices = @transform_0, window_bounds = array<i64: 4, 784>}, {pipeline_mode = #tpu.pipeline_mode<synchronous>, transform_indices = @transform_1, window_bounds = array<i64: 784, 512>}, {pipeline_mode = #tpu.pipeline_mode<synchronous>, transform_indices = @transform_2, window_bounds = array<i64: 1, 512>}, {pipeline_mode = #tpu.pipeline_mode<synchronous>, transform_indices = @transform_3, window_bounds = array<i64: 512, 512>}, {pipeline_mode = #tpu.pipeline_mode<synchronous>, transform_indices = @transform_4, window_bounds = array<i64: 1, 512>}, {pipeline_mode = #tpu.pipeline_mode<synchronous>, transform_indices = @transform_5, window_bounds = array<i64: 512, 128>}, {pipeline_mode = #tpu.pipeline_mode<synchronous>, transform_indices = @transform_6, window_bounds = array<i64: 1, 128>}, {transform_indices = @transform_7, window_bounds = array<i64: 4, 128>}]} {
    %c0 = arith.constant 0 : index
    %c0_0 = arith.constant 0 : index
    %0 = vector.load %arg1[%c0, %c0_0] : memref<4x784xf32, #tpu.memory_space<vmem>>, vector<4x784xf32>
    %1 = arith.truncf %0 : vector<4x784xf32> to vector<4x784xbf16>
    %c0_1 = arith.constant 0 : index
    %c0_2 = arith.constant 0 : index
    %2 = vector.load %arg2[%c0_1, %c0_2] : memref<784x512xbf16, #tpu.memory_space<vmem>>, vector<784x512xbf16>
    %cst = arith.constant dense<0.000000e+00> : vector<4x512xf32>
    %3 = tpu.matmul %1, %2, %cst {dimension_numbers = #tpu.dot_dimension_numbers<[1], [0], [0], [1], [0, 0, 1, 1], [], []>} : vector<4x784xbf16>, vector<784x512xbf16>, vector<4x512xf32> -> vector<4x512xf32>
    %c0_3 = arith.constant 0 : index
    %c0_4 = arith.constant 0 : index
    %4 = vector.load %arg3[%c0_3, %c0_4] : memref<1x512xf32, #tpu.memory_space<vmem>>, vector<1x512xf32>
    %5 = vector.broadcast %4 : vector<1x512xf32> to vector<4x512xf32>
    %6 = arith.addf %3, %5 : vector<4x512xf32>
    %cst_5 = arith.constant 0.000000e+00 : f32
    %7 = vector.broadcast %cst_5 : f32 to vector<4x512xf32>
    %8 = arith.maximumf %6, %7 : vector<4x512xf32>
    %9 = arith.truncf %8 : vector<4x512xf32> to vector<4x512xbf16>
    %c0_6 = arith.constant 0 : index
    %c0_7 = arith.constant 0 : index
    %10 = vector.load %arg4[%c0_6, %c0_7] : memref<512x512xbf16, #tpu.memory_space<vmem>>, vector<512x512xbf16>
    %cst_8 = arith.constant dense<0.000000e+00> : vector<4x512xf32>
    %11 = tpu.matmul %9, %10, %cst_8 {dimension_numbers = #tpu.dot_dimension_numbers<[1], [0], [0], [1], [0, 0, 1, 1], [], []>} : vector<4x512xbf16>, vector<512x512xbf16>, vector<4x512xf32> -> vector<4x512xf32>
    %c0_9 = arith.constant 0 : index
    %c0_10 = arith.constant 0 : index
    %12 = vector.load %arg5[%c0_9, %c0_10] : memref<1x512xf32, #tpu.memory_space<vmem>>, vector<1x512xf32>
    %13 = vector.broadcast %12 : vector<1x512xf32> to vector<4x512xf32>
    %14 = arith.addf %11, %13 : vector<4x512xf32>
    %cst_11 = arith.constant 0.000000e+00 : f32
    %15 = vector.broadcast %cst_11 : f32 to vector<4x512xf32>
    %16 = arith.maximumf %14, %15 : vector<4x512xf32>
    %17 = arith.truncf %16 : vector<4x512xf32> to vector<4x512xbf16>
    %c0_12 = arith.constant 0 : index
    %c0_13 = arith.constant 0 : index
    %18 = vector.load %arg6[%c0_12, %c0_13] : memref<512x128xbf16, #tpu.memory_space<vmem>>, vector<512x128xbf16>
    %cst_14 = arith.constant dense<0.000000e+00> : vector<4x128xf32>
    %19 = tpu.matmul %17, %18, %cst_14 {dimension_numbers = #tpu.dot_dimension_numbers<[1], [0], [0], [1], [0, 0, 1, 1], [], []>} : vector<4x512xbf16>, vector<512x128xbf16>, vector<4x128xf32> -> vector<4x128xf32>
    %c0_15 = arith.constant 0 : index
    %c0_16 = arith.constant 0 : index
    %20 = vector.load %arg7[%c0_15, %c0_16] : memref<1x128xf32, #tpu.memory_space<vmem>>, vector<1x128xf32>
    %21 = vector.broadcast %20 : vector<1x128xf32> to vector<4x128xf32>
    %22 = arith.addf %19, %21 : vector<4x128xf32>
    %23 = arith.truncf %22 : vector<4x128xf32> to vector<4x128xbf16>
    %c0_17 = arith.constant 0 : index
    %c0_18 = arith.constant 0 : index
    %24 = vector.load %arg8[%c0_17, %c0_18] : memref<4x128xbf16, #tpu.memory_space<vmem>>, vector<4x128xbf16>
    tpu.vector_store %arg8[%c0_17, %c0_18], %23 {strides = array<i32>} : memref<4x128xbf16, #tpu.memory_space<vmem>>, vector<4x128xbf16>,
    return
  }
  func.func @transform_0(%arg0: i32) -> (i32, i32) {
    %c0_i32 = arith.constant 0 : i32
    %c0_i32_0 = arith.constant 0 : i32
    return %arg0, %c0_i32 : i32, i32
  }
  func.func @transform_1(%arg0: i32) -> (i32, i32) {
    %c0_i32 = arith.constant 0 : i32
    %c0_i32_0 = arith.constant 0 : i32
    %c0_i32_1 = arith.constant 0 : i32
    return %c0_i32, %c0_i32_0 : i32, i32
  }
  func.func @transform_2(%arg0: i32) -> (i32, i32) {
    %c0_i32 = arith.constant 0 : i32
    %c0_i32_0 = arith.constant 0 : i32
    %c0_i32_1 = arith.constant 0 : i32
    return %c0_i32, %c0_i32_0 : i32, i32
  }
  func.func @transform_3(%arg0: i32) -> (i32, i32) {
    %c0_i32 = arith.constant 0 : i32
    %c0_i32_0 = arith.constant 0 : i32
    %c0_i32_1 = arith.constant 0 : i32
    return %c0_i32, %c0_i32_0 : i32, i32
  }
  func.func @transform_4(%arg0: i32) -> (i32, i32) {
    %c0_i32 = arith.constant 0 : i32
    %c0_i32_0 = arith.constant 0 : i32
    %c0_i32_1 = arith.constant 0 : i32
    return %c0_i32, %c0_i32_0 : i32, i32
  }
  func.func @transform_5(%arg0: i32) -> (i32, i32) {
    %c0_i32 = arith.constant 0 : i32
    %c0_i32_0 = arith.constant 0 : i32
    %c0_i32_1 = arith.constant 0 : i32
    return %c0_i32, %c0_i32_0 : i32, i32
  }
  func.func @transform_6(%arg0: i32) -> (i32, i32) {
    %c0_i32 = arith.constant 0 : i32
    %c0_i32_0 = arith.constant 0 : i32
    %c0_i32_1 = arith.constant 0 : i32
    return %c0_i32, %c0_i32_0 : i32, i32
  }
  func.func @transform_7(%arg0: i32) -> (i32, i32) {
    %c0_i32 = arith.constant 0 : i32
    %c0_i32_0 = arith.constant 0 : i32
    return %arg0, %c0_i32 : i32, i32
  }
}

</mosaic_0001>

<bundles_post_ra>
// kernel: mnist_forward.1
= control target key start
LH: loop header
LB: loop body
LE: loop exit
PB: predicated region body
PF: predicated region fallthrough
CT: control target
= control target key end

     0   :  { %vm1245_vm0 = vcmask 130048   ;;  %s5034_s1 = inlined_call_operand.vmem [shape: bf16[784,512], index: 1, kind: input, shape index: {}]   ;;  %s5035_s0 = inlined_call_operand.vmem [shape: f32[4,784], index: 0, kind: input, shape index: {}]   ;;  %s5036_s3 = inlined_call_operand.vmem [shape: bf16[512,512], index: 3, kind: input, shape index: {}]   ;;  %s5037_s2 = inlined_call_operand.vmem [shape: f32[1,512], index: 2, kind: input, shape index: {}]   ;;  %s5038_s5 = inlined_call_operand.vmem [shape: bf16[512,128], index: 5, kind: input, shape index: {}]   ;;  %s5039_s4 = inlined_call_operand.vmem [shape: f32[1,512], index: 4, kind: input, shape index: {}]   ;;  %s5040_s6 = inlined_call_operand.vmem [shape: f32[1,128], index: 6, kind: input, shape index: {}]   ;;  %s5041_s7 = inlined_call_operand.vmem [shape: bf16[4,128], index: 7, kind: output, shape index: {}]  }
   0x1   :  { %v3300_v0 = vld [vmem:[%s5034_s1 + $0xe4] ss:$16 sps:$4 sm:$0xff]   ;;  %v3304_v2 = vld [vmem:[%s5034_s1 + $0xe0] ss:$16 sps:$4 sm:$0xff]   ;;  %v28_v49 = vld [vmem:[%s5035_s0 + $0x8] sm:$0xff] }
   0x2   :  { %v3302_v1 = vld [vmem:[%s5034_s1 + $0x2e4] ss:$16 sps:$4 sm:$0xff]   ;;  %1249 = vmatprep.subr.bf16.mxu0 %v3300_v0  ;;  %v3305_v3 = vld [vmem:[%s5034_s1 + $0x2e0] ss:$16 sps:$4 sm:$0xff]   ;;  %v35_v52 = vcombine.high %v28_v49, %v28_v49 }
   0x3   :  { %1290 = vmatprep.subr.bf16.mxu1 %v3302_v1  ;;  %v3306_v4 = vld [vmem:[%s5034_s1 + $0xc4] ss:$16 sps:$4 sm:$0xff]   ;;  %1250 = vmatpush1.bf16.msra.mxu0 %v3304_v2  ;;  %v3310_v6 = vld [vmem:[%s5034_s1 + $0xc0] ss:$16 sps:$4 sm:$0xff]  }
   0x4   :  { %1291 = vmatpush1.bf16.msra.mxu1 %v3305_v3  ;;  %v3308_v5 = vld [vmem:[%s5034_s1 + $0x2c4] ss:$16 sps:$4 sm:$0xff]   ;;  %1251 = vmatprep.subr.bf16.mxu0 %v3306_v4  ;;  %v3311_v7 = vld [vmem:[%s5034_s1 + $0x2c0] ss:$16 sps:$4 sm:$0xff]   ;;  %v4020_v55 = vpack.c.bf16 %v35_v52, %v35_v52  ;;  %v3457_v52 = vld [vmem:[%s5034_s1 + $0x1ec] ss:$16 sps:$4 sm:$0xff]  }
   0x5   :  { %1292 = vmatprep.subr.bf16.mxu1 %v3308_v5  ;;  %v3312_v8 = vld [vmem:[%s5034_s1 + $0xa4] ss:$16 sps:$4 sm:$0xff]   ;;  %v3316_v10 = vld [vmem:[%s5034_s1 + $0xa0] ss:$16 sps:$4 sm:$0xff]  }
   0x6   :  { %v3314_v9 = vld [vmem:[%s5034_s1 + $0x2a4] ss:$16 sps:$4 sm:$0xff]   ;;  %v3317_v11 = vld [vmem:[%s5034_s1 + $0x2a0] ss:$16 sps:$4 sm:$0xff]   ;;  %1322 = vmatprep.mubr.bf16.mxu1 %v4020_v55 }
   0x7   :  { %1252 = vmatpush1.bf16.msra.mxu0 %v3310_v6  ;;  %v3318_v12 = vld [vmem:[%s5034_s1 + $0x84] ss:$16 sps:$4 sm:$0xff]   ;;  %v3322_v14 = vld [vmem:[%s5034_s1 + $0x80] ss:$16 sps:$4 sm:$0xff]  }
   0x8   :  { %1293 = vmatpush1.bf16.msra.mxu1 %v3311_v7  ;;  %1253 = vmatprep.subr.bf16.mxu0 %v3312_v8  ;;  %v3320_v13 = vld [vmem:[%s5034_s1 + $0x284] ss:$16 sps:$4 sm:$0xff]   ;;  %v3323_v15 = vld [vmem:[%s5034_s1 + $0x280] ss:$16 sps:$4 sm:$0xff]  }
   0x9   :  { %1294 = vmatprep.subr.bf16.mxu1 %v3314_v9  ;;  %v3324_v16 = vld [vmem:[%s5034_s1 + $0x64] ss:$16 sps:$4 sm:$0xff]   ;;  %v3328_v18 = vld [vmem:[%s5034_s1 + $0x60] ss:$16 sps:$4 sm:$0xff]   ;;  %v4074_v9 = vpack.c.bf16 %v28_v49, %v28_v49 }
   0xa   :  { %v3326_v17 = vld [vmem:[%s5034_s1 + $0x264] ss:$16 sps:$4 sm:$0xff]   ;;  %v3329_v19 = vld [vmem:[%s5034_s1 + $0x260] ss:$16 sps:$4 sm:$0xff]  }
   0xb   :  { %1254 = vmatpush1.bf16.msra.mxu0 %v3316_v10  ;;  %v3330_v20 = vld [vmem:[%s5034_s1 + $0x44] ss:$16 sps:$4 sm:$0xff]   ;;  %v3334_v22 = vld [vmem:[%s5034_s1 + $0x40] ss:$16 sps:$4 sm:$0xff]  }
   0xc   :  { %1295 = vmatpush1.bf16.msra.mxu1 %v3317_v11  ;;  %1255 = vmatprep.subr.bf16.mxu0 %v3318_v12  ;;  %v3332_v21 = vld [vmem:[%s5034_s1 + $0x244] ss:$16 sps:$4 sm:$0xff]   ;;  %v3335_v23 = vld [vmem:[%s5034_s1 + $0x240] ss:$16 sps:$4 sm:$0xff]  }
   0xd   :  { %1296 = vmatprep.subr.bf16.mxu1 %v3320_v13  ;;  %v3336_v24 = vld [vmem:[%s5034_s1 + $0x24] ss:$16 sps:$4 sm:$0xff]   ;;  %v3340_v26 = vld [vmem:[%s5034_s1 + $0x20] ss:$16 sps:$4 sm:$0xff]   ;;  %v3409_v13 = vld [vmem:[%s5034_s1 + $0xec] ss:$16 sps:$4 sm:$0xff]  }
   0xe   :  { %v3338_v25 = vld [vmem:[%s5034_s1 + $0x224] ss:$16 sps:$4 sm:$0xff]   ;;  %v3341_v27 = vld [vmem:[%s5034_s1 + $0x220] ss:$16 sps:$4 sm:$0xff]  }
   0xf   :  { %1256 = vmatpush1.bf16.msra.mxu0 %v3322_v14  ;;  %v3342_v28 = vld [vmem:[%s5034_s1 + $0x4] ss:$16 sps:$4 sm:$0xff]   ;;  %v3346_v30 = vld [vmem:[%s5034_s1] ss:$16 sps:$4 sm:$0xff]   ;;  %v30_v14 = vld [vmem:[%s5035_s0 + $0x18] sm:$0xf] }
  0x10   :  { %1297 = vmatpush1.bf16.msra.mxu1 %v3323_v15  ;;  %1257 = vmatprep.subr.bf16.mxu0 %v3324_v16  ;;  %v3344_v29 = vld [vmem:[%s5034_s1 + $0x204] ss:$16 sps:$4 sm:$0xff]   ;;  %v3347_v31 = vld [vmem:[%s5034_s1 + $0x200] ss:$16 sps:$4 sm:$0xff]   ;;  %v3821_v16 = vmov 0  }
  0x11   :  { %1298 = vmatprep.subr.bf16.mxu1 %v3326_v17  ;;  %v3348_v32 = vld [vmem:[%s5034_s1 + $0x1e4] ss:$16 sps:$4 sm:$0xff]   ;;  %v3352_v34 = vld [vmem:[%s5034_s1 + $0x1e0] ss:$16 sps:$4 sm:$0xff]  }
  0x12   :  { %v3350_v33 = vld [vmem:[%s5034_s1 + $0x3e4] ss:$16 sps:$4 sm:$0xff]   ;;  %v3353_v35 = vld [vmem:[%s5034_s1 + $0x3e0] ss:$16 sps:$4 sm:$0xff]  }
  0x13   :  { %1258 = vmatpush1.bf16.msra.mxu0 %v3328_v18  ;;  %v3354_v36 = vld [vmem:[%s5034_s1 + $0x1c4] ss:$16 sps:$4 sm:$0xff]   ;;  %v3358_v38 = vld [vmem:[%s5034_s1 + $0x1c0] ss:$16 sps:$4 sm:$0xff]   ;;  %v4100_v18 = vpack.c.bf16 %v30_v14, %v30_v14 }
  0x14   :  { %1299 = vmatpush1.bf16.msra.mxu1 %v3329_v19  ;;  %1259 = vmatprep.subr.bf16.mxu0 %v3330_v20  ;;  %v3356_v37 = vld [vmem:[%s5034_s1 + $0x3c4] ss:$16 sps:$4 sm:$0xff]   ;;  %v3359_v39 = vld [vmem:[%s5034_s1 + $0x3c0] ss:$16 sps:$4 sm:$0xff]   ;;  %v3407_v19 = vld [vmem:[%s5034_s1 + $0xe8] ss:$16 sps:$4 sm:$0xff]  }
  0x15   :  { %1300 = vmatprep.subr.bf16.mxu1 %v3332_v21  ;;  %v3360_v40 = vld [vmem:[%s5034_s1 + $0x1a4] ss:$16 sps:$4 sm:$0xff]   ;;  %v3364_v42 = vld [vmem:[%s5034_s1 + $0x1a0] ss:$16 sps:$4 sm:$0xff]   ;;  %v3415_v21 = vld [vmem:[%s5034_s1 + $0xcc] ss:$16 sps:$4 sm:$0xff]  }
  0x16   :  { %v3362_v41 = vld [vmem:[%s5034_s1 + $0x3a4] ss:$16 sps:$4 sm:$0xff]   ;;  %v3365_v43 = vld [vmem:[%s5034_s1 + $0x3a0] ss:$16 sps:$4 sm:$0xff]  }
  0x17   :  { %1260 = vmatpush1.bf16.msra.mxu0 %v3334_v22  ;;  %v3366_v44 = vld [vmem:[%s5034_s1 + $0x184] ss:$16 sps:$4 sm:$0xff]   ;;  %v3370_v47 = vld [vmem:[%s5034_s1 + $0x180] ss:$16 sps:$4 sm:$0xff]  }
  0x18   :  { %1301 = vmatpush1.bf16.msra.mxu1 %v3335_v23  ;;  %1261 = vmatprep.subr.bf16.mxu0 %v3336_v24  ;;  %v3368_v45 = vld [vmem:[%s5034_s1 + $0x384] ss:$16 sps:$4 sm:$0xff]   ;;  %v3371_v50 = vld [vmem:[%s5034_s1 + $0x380] ss:$16 sps:$4 sm:$0xff]   ;;  %v3413_v23 = vld [vmem:[%s5034_s1 + $0xc8] ss:$16 sps:$4 sm:$0xff]  }
  0x19   :  { %1302 = vmatprep.subr.bf16.mxu1 %v3338_v25  ;;  %v27_v46 = vld [vmem:[%s5035_s0] sm:$0xff]  ;;  %v3421_v25 = vld [vmem:[%s5034_s1 + $0xac] ss:$16 sps:$4 sm:$0xff]  }
  0x1a   :  { %v34_v48 = vcombine.high %v27_v46, %v27_v46  ;;  %v3372_v51 = vld [vmem:[%s5034_s1 + $0x164] ss:$16 sps:$4 sm:$0xff]   ;;  %v3376_v56 = vld [vmem:[%s5034_s1 + $0x160] ss:$16 sps:$4 sm:$0xff]   ;;  %v4072_v8 = vpack.c.bf16 %v27_v46, %v27_v46  ;;  %v3443_v46 = vld [vmem:[%s5034_s1 + $0x28] ss:$16 sps:$4 sm:$0xff]  }
  0x1b   :  { %1262 = vmatpush1.bf16.msra.mxu0 %v3340_v26  ;;  %v3374_v53 = vld [vmem:[%s5034_s1 + $0x364] ss:$16 sps:$4 sm:$0xff]   ;;  %v3377_v57 = vld [vmem:[%s5034_s1 + $0x360] ss:$16 sps:$4 sm:$0xff]  }
  0x1c   :  { %1303 = vmatpush1.bf16.msra.mxu1 %v3341_v27  ;;  %1263 = vmatprep.subr.bf16.mxu0 %v3342_v28  ;;  %v4018_v54 = vpack.c.bf16 %v34_v48, %v34_v48  ;;  %v3378_v58 = vld [vmem:[%s5034_s1 + $0x144] ss:$16 sps:$4 sm:$0xff]   ;;  %v3382_v60 = vld [vmem:[%s5034_s1 + $0x140] ss:$16 sps:$4 sm:$0xff]   ;;  %v3419_v27 = vld [vmem:[%s5034_s1 + $0xa8] ss:$16 sps:$4 sm:$0xff]  }
  0x1d   :  { %1304 = vmatprep.subr.bf16.mxu1 %v3344_v29  ;;  %v3380_v59 = vld [vmem:[%s5034_s1 + $0x344] ss:$16 sps:$4 sm:$0xff]   ;;  %v3383_v61 = vld [vmem:[%s5034_s1 + $0x340] ss:$16 sps:$4 sm:$0xff]   ;;  %v3427_v29 = vld [vmem:[%s5034_s1 + $0x8c] ss:$16 sps:$4 sm:$0xff]  }
  0x1e   :  { %1281 = vmatprep.mubr.bf16.mxu0 %v4018_v54  ;;  %v3384_v62 = vld [vmem:[%s5034_s1 + $0x124] ss:$16 sps:$4 sm:$0xff]   ;;  %v3388_v0 = vld [vmem:[%s5034_s1 + $0x120] ss:$16 sps:$4 sm:$0xff]   ;;  %v3451_v48 = vld [vmem:[%s5034_s1 + $0xc] ss:$16 sps:$4 sm:$0xff]  }
  0x1f   :  { %1264 = vmatpush1.bf16.msra.mxu0 %v3346_v30  ;;  %v3386_v63 = vld [vmem:[%s5034_s1 + $0x324] ss:$16 sps:$4 sm:$0xff]   ;;  %v3389_v1 = vld [vmem:[%s5034_s1 + $0x320] ss:$16 sps:$4 sm:$0xff]  }
  0x20   :  { %1305 = vmatpush1.bf16.msra.mxu1 %v3347_v31  ;;  %1265 = vmatprep.subr.bf16.mxu0 %v3348_v32  ;;  %v3390_v2 = vld [vmem:[%s5034_s1 + $0x104] ss:$16 sps:$4 sm:$0xff]   ;;  %v3394_v4 = vld [vmem:[%s5034_s1 + $0x100] ss:$16 sps:$4 sm:$0xff]   ;;  %v3425_v31 = vld [vmem:[%s5034_s1 + $0x88] ss:$16 sps:$4 sm:$0xff]  }
  0x21   :  { %1306 = vmatprep.subr.bf16.mxu1 %v3350_v33  ;;  %v3392_v3 = vld [vmem:[%s5034_s1 + $0x304] ss:$16 sps:$4 sm:$0xff]   ;;  %v3395_v5 = vld [vmem:[%s5034_s1 + $0x300] ss:$16 sps:$4 sm:$0xff]   ;;  %v3433_v33 = vld [vmem:[%s5034_s1 + $0x6c] ss:$16 sps:$4 sm:$0xff]  }
  0x22   :  { %v3400_v6 = vld [vmem:[%s5034_s1 + $0x4e4] ss:$16 sps:$4 sm:$0xff]   ;;  %v3398_v10 = vld [vmem:[%s5034_s1 + $0x4e0] ss:$16 sps:$4 sm:$0xff]  }
  0x23   :  { %1266 = vmatpush2.bf16.msra.mxu0 %v3352_v34  ;;  %v3403_v7 = vld [vmem:[%s5034_s1 + $0x604] ss:$16 sps:$4 sm:$0xff]   ;;  %v3401_v11 = vld [vmem:[%s5034_s1 + $0x600] ss:$16 sps:$4 sm:$0xff]  }
  0x24   :  { %1307 = vmatpush2.bf16.msra.mxu1 %v3353_v35  ;;  %1267 = vmatprep.subr.bf16.mxu0 %v3354_v36  ;;  %v3406_v12 = vld [vmem:[%s5034_s1 + $0x4c4] ss:$16 sps:$4 sm:$0xff]   ;;  %v3404_v15 = vld [vmem:[%s5034_s1 + $0x4c0] ss:$16 sps:$4 sm:$0xff]  }
  0x25   :  { %1308 = vmatprep.subr.bf16.mxu1 %v3356_v37  ;;  %v3412_v17 = vld [vmem:[%s5034_s1 + $0x4a4] ss:$16 sps:$4 sm:$0xff]   ;;  %v3410_v20 = vld [vmem:[%s5034_s1 + $0x4a0] ss:$16 sps:$4 sm:$0xff]   ;;  %v3431_v37 = vld [vmem:[%s5034_s1 + $0x68] ss:$16 sps:$4 sm:$0xff]  }
  0x26   :  { %v3418_v22 = vld [vmem:[%s5034_s1 + $0x484] ss:$16 sps:$4 sm:$0xff]   ;;  %v3416_v24 = vld [vmem:[%s5034_s1 + $0x480] ss:$16 sps:$4 sm:$0xff]  }
  0x27   :  { %1268 = vmatpush2.bf16.msra.mxu0 %v3358_v38  ;;  %v3424_v26 = vld [vmem:[%s5034_s1 + $0x464] ss:$16 sps:$4 sm:$0xff]   ;;  %v3422_v28 = vld [vmem:[%s5034_s1 + $0x460] ss:$16 sps:$4 sm:$0xff]  }
  0x28   :  { %1309 = vmatpush2.bf16.msra.mxu1 %v3359_v39  ;;  %1269 = vmatprep.subr.bf16.mxu0 %v3360_v40  ;;  %v3430_v30 = vld [vmem:[%s5034_s1 + $0x444] ss:$16 sps:$4 sm:$0xff]   ;;  %v3428_v32 = vld [vmem:[%s5034_s1 + $0x440] ss:$16 sps:$4 sm:$0xff]   ;;  %v3439_v39 = vld [vmem:[%s5034_s1 + $0x4c] ss:$16 sps:$4 sm:$0xff]  }
  0x29   :  { %1310 = vmatprep.subr.bf16.mxu1 %v3362_v41  ;;  %v3436_v34 = vld [vmem:[%s5034_s1 + $0x424] ss:$16 sps:$4 sm:$0xff]   ;;  %v3434_v38 = vld [vmem:[%s5034_s1 + $0x420] ss:$16 sps:$4 sm:$0xff]  }
  0x2a   :  { %v4156_v35 = vld [vmem:[%s5035_s0 + $0x10] sm:$0xff] }
  0x2b   :  { %1270 = vmatpush2.bf16.msra.mxu0 %v3364_v42  ;;  %v36_v36 = vcombine.high %v4156_v35, %v4156_v35  ;;  %v3442_v41 = vld [vmem:[%s5034_s1 + $0x404] ss:$16 sps:$4 sm:$0xff]   ;;  %v3437_v42 = vld [vmem:[%s5034_s1 + $0x48] ss:$16 sps:$4 sm:$0xff]   ;;  %v3488_v14 = vld [vmem:[%s5034_s1 + $0x500] ss:$16 sps:$4 sm:$0xff]  }
  0x2c   :  { %1311 = vmatpush2.bf16.msra.mxu1 %v3365_v43  ;;  %1271 = vmatprep.subr.bf16.mxu0 %v3366_v44  ;;  %v3440_v43 = vld [vmem:[%s5034_s1 + $0x400] ss:$16 sps:$4 sm:$0xff]   ;;  %v3445_v44 = vld [vmem:[%s5034_s1 + $0x2c] ss:$16 sps:$4 sm:$0xff]   ;;  %v3454_v49 = vld [vmem:[%s5034_s1 + $0x5c4] ss:$16 sps:$4 sm:$0xff]  }
  0x2d   :  { %1312 = vmatprep.subr.bf16.mxu1 %v3368_v45  ;;  %v4169_v40 = vpack.c.bf16 %v36_v36, %v36_v36  ;;  %v3448_v45 = vld [vmem:[%s5034_s1 + $0x5e4] ss:$16 sps:$4 sm:$0xff]   ;;  %v3524_v36 = vld [vmem:[%s5034_s1 + $0x48c] ss:$16 sps:$4 sm:$0xff]  }
  0x2f   :  { %1272 = vmatpush2.bf16.msra.mxu0 %v3370_v47  ;;  %v3446_v47 = vld [vmem:[%s5034_s1 + $0x5e0] ss:$16 sps:$4 sm:$0xff]  }
  0x30   :  { %1313 = vmatpush2.bf16.msra.mxu1 %v3371_v50  ;;  %1273 = vmatprep.subr.bf16.mxu0 %v3372_v51  ;;  %v3449_v50 = vld [vmem:[%s5034_s1 + $0x8] ss:$16 sps:$4 sm:$0xff]   ;;  %v3452_v51 = vld [vmem:[%s5034_s1 + $0x5c0] ss:$16 sps:$4 sm:$0xff]  }
  0x31   :  { %1314 = vmatprep.subr.bf16.mxu1 %v3374_v53  ;;  %v3460_v53 = vld [vmem:[%s5034_s1 + $0x5a4] ss:$16 sps:$4 sm:$0xff]  }
  0x33   :  { %1274 = vmatpush2.bf16.msra.mxu0 %v3376_v56  ;;  %v3458_v56 = vld [vmem:[%s5034_s1 + $0x5a0] ss:$16 sps:$4 sm:$0xff]  }
  0x34   :  { %1315 = vmatpush2.bf16.msra.mxu1 %v3377_v57  ;;  %1275 = vmatprep.subr.bf16.mxu0 %v3378_v58  ;;  %v3463_v57 = vld [vmem:[%s5034_s1 + $0x1cc] ss:$16 sps:$4 sm:$0xff]   ;;  %v3466_v58 = vld [vmem:[%s5034_s1 + $0x584] ss:$16 sps:$4 sm:$0xff]  }
  0x35   :  { %1316 = vmatprep.subr.bf16.mxu1 %v3380_v59  ;;  %v3461_v59 = vld [vmem:[%s5034_s1 + $0x1c8] ss:$16 sps:$4 sm:$0xff]  }
  0x37   :  { %1276 = vmatpush2.bf16.msra.mxu0 %v3382_v60  ;;  %v3464_v60 = vld [vmem:[%s5034_s1 + $0x580] ss:$16 sps:$4 sm:$0xff]  }
  0x38   :  { %1317 = vmatpush2.bf16.msra.mxu1 %v3383_v61  ;;  %1277 = vmatprep.subr.bf16.mxu0 %v3384_v62  ;;  %v3469_v61 = vld [vmem:[%s5034_s1 + $0x1ac] ss:$16 sps:$4 sm:$0xff]   ;;  %v3472_v62 = vld [vmem:[%s5034_s1 + $0x564] ss:$16 sps:$4 sm:$0xff]  }
  0x39   :  { %1318 = vmatprep.subr.bf16.mxu1 %v3386_v63  ;;  %v3467_v63 = vld [vmem:[%s5034_s1 + $0x1a8] ss:$16 sps:$4 sm:$0xff]  }
  0x3b   :  { %1278 = vmatpush2.bf16.msra.mxu0 %v3388_v0  ;;  %v3470_v0 = vld [vmem:[%s5034_s1 + $0x560] ss:$16 sps:$4 sm:$0xff]  }
  0x3c   :  { %1319 = vmatpush2.bf16.msra.mxu1 %v3389_v1  ;;  %1279 = vmatprep.subr.bf16.mxu0 %v3390_v2  ;;  %v3475_v1 = vld [vmem:[%s5034_s1 + $0x18c] ss:$16 sps:$4 sm:$0xff]   ;;  %v3478_v2 = vld [vmem:[%s5034_s1 + $0x544] ss:$16 sps:$4 sm:$0xff]  }
  0x3d   :  { %1320 = vmatprep.subr.bf16.mxu1 %v3392_v3  ;;  %v3473_v3 = vld [vmem:[%s5034_s1 + $0x188] ss:$16 sps:$4 sm:$0xff]  }
  0x3f   :  { %1280 = vmatpush2.bf16.msra.mxu0 %v3394_v4  ;;  %v3476_v4 = vld [vmem:[%s5034_s1 + $0x540] ss:$16 sps:$4 sm:$0xff]  }
  0x40   :  { %1321 = vmatpush2.bf16.msra.mxu1 %v3395_v5  ;;  %1331 = vmatprep.subr.bf16.mxu0 %v3400_v6  ;;  %v3481_v5 = vld [vmem:[%s5034_s1 + $0x16c] ss:$16 sps:$4 sm:$0xff]   ;;  %v3484_v6 = vld [vmem:[%s5034_s1 + $0x524] ss:$16 sps:$4 sm:$0xff]  }
  0x41   :  { %1386 = vmatprep.subr.bf16.mxu1 %v3403_v7  ;;  %v3479_v7 = vld [vmem:[%s5034_s1 + $0x168] ss:$16 sps:$4 sm:$0xff]  }
  0x42   :  { %1282 = vmatmul.mubr.bf16.vlgmr.msra.gmra.mxu0 %v4072_v8 }
  0x43   :  { %1323 = vmatmul.mubr.bf16.vlgmr.msra.gmra.mxu1 %v4074_v9  ;;  %1332 = vmatpush1.bf16.msra.mxu0 %v3398_v10  ;;  %v3482_v10 = vld [vmem:[%s5034_s1 + $0x520] ss:$16 sps:$4 sm:$0xff]  }
  0x44   :  { %1387 = vmatpush1.bf16.msra.mxu1 %v3401_v11  ;;  %1333 = vmatprep.subr.bf16.mxu0 %v3406_v12  ;;  %v3487_v11 = vld [vmem:[%s5034_s1 + $0x14c] ss:$16 sps:$4 sm:$0xff]   ;;  %v3490_v12 = vld [vmem:[%s5034_s1 + $0x504] ss:$16 sps:$4 sm:$0xff]  }
  0x45   :  { %1404 = vmatprep.mubr.bf16.mxu1 %v3821_v16  ;;  %1413 = vmatprep.subr.bf16.mxu1 %v3409_v13  ;;  %v3485_v13 = vld [vmem:[%s5034_s1 + $0x148] ss:$16 sps:$4 sm:$0xff]  }
  0x46   :  { %1363 = vmatprep.mubr.bf16.mxu0 %v4169_v40 }
  0x47   :  { %1334 = vmatpush1.bf16.msra.mxu0 %v3404_v15  ;;  %v3494_v15 = vld [vmem:[%s5034_s1 + $0x12c] ss:$16 sps:$4 sm:$0xff]  }
  0x48   :  { %1335 = vmatprep.subr.bf16.mxu0 %v3412_v17  ;;  %v3497_v17 = vld [vmem:[%s5034_s1 + $0x2ec] ss:$16 sps:$4 sm:$0xff]  }
  0x4b   :  { %3092 = vmatmul.mubr.msk.bf16.vlgmr.msra.gmra.mxu1 %vm1245_vm0, %v4100_v18  ;;  %1336 = vmatpush1.bf16.msra.mxu0 %v3410_v20  ;;  %v3492_v20 = vld [vmem:[%s5034_s1 + $0x128] ss:$16 sps:$4 sm:$0xff]  }
  0x4c   :  { %1414 = vmatpush1.bf16.msra.mxu1 %v3407_v19  ;;  %1337 = vmatprep.subr.bf16.mxu0 %v3418_v22  ;;  %v4285_v19 = vpack.c.bf16 %v4156_v35, %v4156_v35  ;;  %v3500_v22 = vld [vmem:[%s5034_s1 + $0x10c] ss:$16 sps:$4 sm:$0xff]   ;;  %v3519_v35 = vld [vmem:[%s5034_s1 + $0x268] ss:$16 sps:$4 sm:$0xff]  }
  0x4d   :  { %1415 = vmatprep.subr.bf16.mxu1 %v3415_v21  ;;  %1445 = vmatprep.mubr.bf16.mxu1 %v4018_v54  ;;  %v3455_v54 = vld [vmem:[%s5034_s1 + $0x1e8] ss:$16 sps:$4 sm:$0xff]  }
  0x4e   :  { %v3495_v21 = vld [vmem:[%s5034_s1 + $0x2e8] ss:$16 sps:$4 sm:$0xff]  }
  0x4f   :  { %1338 = vmatpush1.bf16.msra.mxu0 %v3416_v24  ;;  %v3498_v24 = vld [vmem:[%s5034_s1 + $0x108] ss:$16 sps:$4 sm:$0xff]  }
  0x50   :  { %1416 = vmatpush1.bf16.msra.mxu1 %v3413_v23  ;;  %1339 = vmatprep.subr.bf16.mxu0 %v3424_v26  ;;  %v3503_v23 = vld [vmem:[%s5034_s1 + $0x2cc] ss:$16 sps:$4 sm:$0xff]  }
  0x51   :  { %1417 = vmatprep.subr.bf16.mxu1 %v3421_v25  ;;  %v3501_v25 = vld [vmem:[%s5034_s1 + $0x2c8] ss:$16 sps:$4 sm:$0xff]   ;;  %v3506_v26 = vld [vmem:[%s5034_s1 + $0x4ec] ss:$16 sps:$4 sm:$0xff]  }
  0x53   :  { %1340 = vmatpush1.bf16.msra.mxu0 %v3422_v28  ;;  %v3504_v28 = vld [vmem:[%s5034_s1 + $0x4e8] ss:$16 sps:$4 sm:$0xff]  }
  0x54   :  { %1418 = vmatpush1.bf16.msra.mxu1 %v3419_v27  ;;  %1341 = vmatprep.subr.bf16.mxu0 %v3430_v30  ;;  %v3509_v27 = vld [vmem:[%s5034_s1 + $0x2ac] ss:$16 sps:$4 sm:$0xff]  }
  0x55   :  { %1419 = vmatprep.subr.bf16.mxu1 %v3427_v29  ;;  %v3507_v29 = vld [vmem:[%s5034_s1 + $0x2a8] ss:$16 sps:$4 sm:$0xff]   ;;  %v3512_v30 = vld [vmem:[%s5034_s1 + $0x4cc] ss:$16 sps:$4 sm:$0xff]  }
  0x57   :  { %1342 = vmatpush1.bf16.msra.mxu0 %v3428_v32  ;;  %v3513_v32 = vld [vmem:[%s5034_s1 + $0x288] ss:$16 sps:$4 sm:$0xff]  }
  0x58   :  { %1420 = vmatpush1.bf16.msra.mxu1 %v3425_v31  ;;  %1343 = vmatprep.subr.bf16.mxu0 %v3436_v34  ;;  %v3510_v31 = vld [vmem:[%s5034_s1 + $0x4c8] ss:$16 sps:$4 sm:$0xff]  }
  0x59   :  { %1421 = vmatprep.subr.bf16.mxu1 %v3433_v33  ;;  %v3518_v33 = vld [vmem:[%s5034_s1 + $0x4ac] ss:$16 sps:$4 sm:$0xff]   ;;  %v3516_v34 = vld [vmem:[%s5034_s1 + $0x4a8] ss:$16 sps:$4 sm:$0xff]  }
  0x5b   :  { %1344 = vmatpush1.bf16.msra.mxu0 %v3434_v38  ;;  %v3522_v38 = vld [vmem:[%s5034_s1 + $0x488] ss:$16 sps:$4 sm:$0xff]  }
  0x5c   :  { %1422 = vmatpush1.bf16.msra.mxu1 %v3431_v37  ;;  %1345 = vmatprep.subr.bf16.mxu0 %v3442_v41  ;;  %v3527_v37 = vld [vmem:[%s5034_s1 + $0x24c] ss:$16 sps:$4 sm:$0xff]  }
  0x5d   :  { %1423 = vmatprep.subr.bf16.mxu1 %v3439_v39  ;;  %v3525_v39 = vld [vmem:[%s5034_s1 + $0x248] ss:$16 sps:$4 sm:$0xff]   ;;  %v3533_v41 = vld [vmem:[%s5034_s1 + $0x22c] ss:$16 sps:$4 sm:$0xff]  }
  0x5f   :  { %1346 = vmatpush1.bf16.msra.mxu0 %v3440_v43  ;;  %v3531_v43 = vld [vmem:[%s5034_s1 + $0x228] ss:$16 sps:$4 sm:$0xff]  }
  0x60   :  { %1424 = vmatpush1.bf16.msra.mxu1 %v3437_v42  ;;  %1347 = vmatprep.subr.bf16.mxu0 %v3448_v45  ;;  %v3528_v42 = vld [vmem:[%s5034_s1 + $0x468] ss:$16 sps:$4 sm:$0xff]   ;;  %v3539_v45 = vld [vmem:[%s5034_s1 + $0x20c] ss:$16 sps:$4 sm:$0xff]  }
  0x61   :  { %1425 = vmatprep.subr.bf16.mxu1 %v3445_v44  ;;  %v3536_v44 = vld [vmem:[%s5034_s1 + $0x44c] ss:$16 sps:$4 sm:$0xff]  }
  0x63   :  { %1348 = vmatpush2.bf16.msra.mxu0 %v3446_v47  ;;  %v3537_v47 = vld [vmem:[%s5034_s1 + $0x208] ss:$16 sps:$4 sm:$0xff]  }
  0x64   :  { %1426 = vmatpush1.bf16.msra.mxu1 %v3443_v46  ;;  %1349 = vmatprep.subr.bf16.mxu0 %v3454_v49  ;;  %v3534_v46 = vld [vmem:[%s5034_s1 + $0x448] ss:$16 sps:$4 sm:$0xff]   ;;  %v3545_v49 = vld [vmem:[%s5034_s1 + $0x3ec] ss:$16 sps:$4 sm:$0xff]  }
  0x65   :  { %1427 = vmatprep.subr.bf16.mxu1 %v3451_v48  ;;  %v3542_v48 = vld [vmem:[%s5034_s1 + $0x42c] ss:$16 sps:$4 sm:$0xff]  }
  0x67   :  { %1350 = vmatpush2.bf16.msra.mxu0 %v3452_v51  ;;  %v3543_v51 = vld [vmem:[%s5034_s1 + $0x3e8] ss:$16 sps:$4 sm:$0xff]  }
  0x68   :  { %1428 = vmatpush1.bf16.msra.mxu1 %v3449_v50  ;;  %1351 = vmatprep.subr.bf16.mxu0 %v3460_v53  ;;  %v3540_v50 = vld [vmem:[%s5034_s1 + $0x428] ss:$16 sps:$4 sm:$0xff]   ;;  %v3551_v53 = vld [vmem:[%s5034_s1 + $0x3cc] ss:$16 sps:$4 sm:$0xff]  }
  0x69   :  { %1429 = vmatprep.subr.bf16.mxu1 %v3457_v52  ;;  %v3548_v52 = vld [vmem:[%s5034_s1 + $0x40c] ss:$16 sps:$4 sm:$0xff]  }
  0x6b   :  { %1352 = vmatpush2.bf16.msra.mxu0 %v3458_v56  ;;  %v3549_v56 = vld [vmem:[%s5034_s1 + $0x3c8] ss:$16 sps:$4 sm:$0xff]  }
  0x6c   :  { %1430 = vmatpush2.bf16.msra.mxu1 %v3455_v54  ;;  %1353 = vmatprep.subr.bf16.mxu0 %v3466_v58  ;;  %v3546_v54 = vld [vmem:[%s5034_s1 + $0x408] ss:$16 sps:$4 sm:$0xff]   ;;  %v3557_v58 = vld [vmem:[%s5034_s1 + $0x3ac] ss:$16 sps:$4 sm:$0xff]  }
  0x6d   :  { %1431 = vmatprep.subr.bf16.mxu1 %v3463_v57  ;;  %v3554_v57 = vld [vmem:[%s5034_s1 + $0x5ec] ss:$16 sps:$4 sm:$0xff]  }
  0x6f   :  { %1354 = vmatpush2.bf16.msra.mxu0 %v3464_v60  ;;  %v3555_v60 = vld [vmem:[%s5034_s1 + $0x3a8] ss:$16 sps:$4 sm:$0xff]  }
  0x70   :  { %1432 = vmatpush2.bf16.msra.mxu1 %v3461_v59  ;;  %1355 = vmatprep.subr.bf16.mxu0 %v3472_v62  ;;  %v3552_v59 = vld [vmem:[%s5034_s1 + $0x5e8] ss:$16 sps:$4 sm:$0xff]   ;;  %v3563_v62 = vld [vmem:[%s5034_s1 + $0x38c] ss:$16 sps:$4 sm:$0xff]  }
  0x71   :  { %1433 = vmatprep.subr.bf16.mxu1 %v3469_v61  ;;  %v3560_v61 = vld [vmem:[%s5034_s1 + $0x5cc] ss:$16 sps:$4 sm:$0xff]  }
  0x73   :  { %1356 = vmatpush2.bf16.msra.mxu0 %v3470_v0  ;;  %v3561_v0 = vld [vmem:[%s5034_s1 + $0x388] ss:$16 sps:$4 sm:$0xff]  }
  0x74   :  { %1434 = vmatpush2.bf16.msra.mxu1 %v3467_v63  ;;  %1357 = vmatprep.subr.bf16.mxu0 %v3478_v2  ;;  %v3558_v63 = vld [vmem:[%s5034_s1 + $0x5c8] ss:$16 sps:$4 sm:$0xff]   ;;  %v3569_v2 = vld [vmem:[%s5034_s1 + $0x36c] ss:$16 sps:$4 sm:$0xff]  }
  0x75   :  { %1435 = vmatprep.subr.bf16.mxu1 %v3475_v1  ;;  %v3566_v1 = vld [vmem:[%s5034_s1 + $0x5ac] ss:$16 sps:$4 sm:$0xff]  }
  0x77   :  { %1358 = vmatpush2.bf16.msra.mxu0 %v3476_v4  ;;  %v3567_v4 = vld [vmem:[%s5034_s1 + $0x368] ss:$16 sps:$4 sm:$0xff]  }
  0x78   :  { %1436 = vmatpush2.bf16.msra.mxu1 %v3473_v3  ;;  %1359 = vmatprep.subr.bf16.mxu0 %v3484_v6  ;;  %v3564_v3 = vld [vmem:[%s5034_s1 + $0x5a8] ss:$16 sps:$4 sm:$0xff]   ;;  %v3575_v6 = vld [vmem:[%s5034_s1 + $0x34c] ss:$16 sps:$4 sm:$0xff]  }
  0x79   :  { %1437 = vmatprep.subr.bf16.mxu1 %v3481_v5  ;;  %v3572_v5 = vld [vmem:[%s5034_s1 + $0x58c] ss:$16 sps:$4 sm:$0xff]  }
  0x7b   :  { %1360 = vmatpush2.bf16.msra.mxu0 %v3482_v10  ;;  %v3573_v10 = vld [vmem:[%s5034_s1 + $0x348] ss:$16 sps:$4 sm:$0xff]  }
  0x7c   :  { %1438 = vmatpush2.bf16.msra.mxu1 %v3479_v7  ;;  %1361 = vmatprep.subr.bf16.mxu0 %v3490_v12  ;;  %v3570_v7 = vld [vmem:[%s5034_s1 + $0x588] ss:$16 sps:$4 sm:$0xff]   ;;  %v3581_v12 = vld [vmem:[%s5034_s1 + $0x32c] ss:$16 sps:$4 sm:$0xff]  }
  0x7d   :  { %1439 = vmatprep.subr.bf16.mxu1 %v3487_v11  ;;  %v3578_v11 = vld [vmem:[%s5034_s1 + $0x56c] ss:$16 sps:$4 sm:$0xff]  }
  0x7f   :  { %1362 = vmatpush2.bf16.msra.mxu0 %v3488_v14  ;;  %v3579_v14 = vld [vmem:[%s5034_s1 + $0x328] ss:$16 sps:$4 sm:$0xff]  }
  0x80   :  { %1440 = vmatpush2.bf16.msra.mxu1 %v3485_v13  ;;  %1454 = vmatprep.subr.bf16.mxu0 %v3497_v17  ;;  %v3576_v13 = vld [vmem:[%s5034_s1 + $0x568] ss:$16 sps:$4 sm:$0xff]   ;;  %v3587_v17 = vld [vmem:[%s5034_s1 + $0x30c] ss:$16 sps:$4 sm:$0xff]  }
  0x81   :  { %1441 = vmatprep.subr.bf16.mxu1 %v3494_v15  ;;  %v3584_v15 = vld [vmem:[%s5034_s1 + $0x54c] ss:$16 sps:$4 sm:$0xff]  }
  0x82   :  { %1364 = vmatmul.mubr.bf16.vlgmr.msra.gmra.mxu0 %v4285_v19 }
  0x83   :  { %1455 = vmatpush1.bf16.msra.mxu0 %v3495_v21  ;;  %1486 = vmatprep.mubr.bf16.mxu0 %v4020_v55  ;;  %v3515_v55 = vld [vmem:[%s5034_s1 + $0x28c] ss:$16 sps:$4 sm:$0xff]   ;;  %v3585_v21 = vld [vmem:[%s5034_s1 + $0x308] ss:$16 sps:$4 sm:$0xff]  }
  0x84   :  { %1442 = vmatpush2.bf16.msra.mxu1 %v3492_v20  ;;  %1456 = vmatprep.subr.bf16.mxu0 %v3503_v23  ;;  %v3582_v20 = vld [vmem:[%s5034_s1 + $0x548] ss:$16 sps:$4 sm:$0xff]   ;;  %v3593_v23 = vld [vmem:[%s5034_s1 + $0x60c] ss:$16 sps:$4 sm:$0xff]  }
  0x85   :  { %1443 = vmatprep.subr.bf16.mxu1 %v3500_v22  ;;  %v3590_v22 = vld [vmem:[%s5034_s1 + $0x52c] ss:$16 sps:$4 sm:$0xff]  }
  0x87   :  { %1457 = vmatpush1.bf16.msra.mxu0 %v3501_v25  ;;  %v3591_v25 = vld [vmem:[%s5034_s1 + $0x608] ss:$16 sps:$4 sm:$0xff]  }
  0x88   :  { %1444 = vmatpush2.bf16.msra.mxu1 %v3498_v24  ;;  %1458 = vmatprep.subr.bf16.mxu0 %v3509_v27  ;;  %v3588_v24 = vld [vmem:[%s5034_s1 + $0x528] ss:$16 sps:$4 sm:$0xff]   ;;  %v3599_v27 = vld [vmem:[%s5036_s3 + $0xe4] ss:$16 sps:$4 sm:$0xff]  }
  0x89   :  { %1495 = vmatprep.subr.bf16.mxu1 %v3506_v26  ;;  %v3596_v26 = vld [vmem:[%s5034_s1 + $0x50c] ss:$16 sps:$4 sm:$0xff]  }
  0x8b   :  { %1446 = vmatmul.mubr.bf16.vlgmr.msra.gmra.mxu1 %v4072_v8  ;;  %1459 = vmatpush1.bf16.msra.mxu0 %v3507_v29  ;;  %v3521_v8 = vld [vmem:[%s5034_s1 + $0x26c] ss:$16 sps:$4 sm:$0xff]   ;;  %v3597_v29 = vld [vmem:[%s5036_s3 + $0xe0] ss:$16 sps:$4 sm:$0xff]  }
  0x8c   :  { %1496 = vmatpush1.bf16.msra.mxu1 %v3504_v28  ;;  %1460 = vmatprep.subr.bf16.mxu0 %v3515_v55  ;;  %v3594_v28 = vld [vmem:[%s5034_s1 + $0x508] ss:$16 sps:$4 sm:$0xff]   ;;  %v3603_v55 = vld [vmem:[%s5036_s3 + $0xa0] ss:$16 sps:$4 sm:$0xff]  }
  0x8d   :  { %1497 = vmatprep.subr.bf16.mxu1 %v3512_v30  ;;  %1527 = vmatprep.mubr.bf16.mxu1 %v4169_v40  ;;  %v3530_v40 = vld [vmem:[%s5034_s1 + $0x46c] ss:$16 sps:$4 sm:$0xff]   ;;  %v3602_v30 = vld [vmem:[%s5036_s3 + $0xc4] ss:$16 sps:$4 sm:$0xff]  }
  0x8f   :  { %1461 = vmatpush1.bf16.msra.mxu0 %v3513_v32  ;;  %v3653_v32 = vld [vmem:[%s5036_s3 + $0x2e4] ss:$16 sps:$4 sm:$0xff]  }
  0x90   :  { %1498 = vmatpush1.bf16.msra.mxu1 %v3510_v31  ;;  %1462 = vmatprep.subr.bf16.mxu0 %v3521_v8  ;;  %v3651_v31 = vld [vmem:[%s5036_s3 + $0x2e0] ss:$16 sps:$4 sm:$0xff]  }
  0x91   :  { %1499 = vmatprep.subr.bf16.mxu1 %v3518_v33  ;;  %v3611_v33 = vld [vmem:[%s5036_s3 + $0x64] ss:$16 sps:$4 sm:$0xff]   ;;  %v3609_v8 = vld [vmem:[%s5036_s3 + $0x60] ss:$16 sps:$4 sm:$0xff]  }
  0x93   :  { %1463 = vmatpush1.bf16.msra.mxu0 %v3519_v35  ;;  %v3659_v35 = vld [vmem:[%s5036_s3 + $0x2c4] ss:$16 sps:$4 sm:$0xff]  }
  0x94   :  { %1500 = vmatpush1.bf16.msra.mxu1 %v3516_v34  ;;  %1464 = vmatprep.subr.bf16.mxu0 %v3527_v37  ;;  %v3657_v34 = vld [vmem:[%s5036_s3 + $0x2c0] ss:$16 sps:$4 sm:$0xff]  }
  0x95   :  { %1501 = vmatprep.subr.bf16.mxu1 %v3524_v36  ;;  %v3614_v36 = vld [vmem:[%s5036_s3 + $0x44] ss:$16 sps:$4 sm:$0xff]   ;;  %v3612_v37 = vld [vmem:[%s5036_s3 + $0x40] ss:$16 sps:$4 sm:$0xff]  }
  0x97   :  { %1465 = vmatpush1.bf16.msra.mxu0 %v3525_v39  ;;  %v3665_v39 = vld [vmem:[%s5036_s3 + $0x2a4] ss:$16 sps:$4 sm:$0xff]  }
  0x98   :  { %1502 = vmatpush1.bf16.msra.mxu1 %v3522_v38  ;;  %1466 = vmatprep.subr.bf16.mxu0 %v3533_v41  ;;  %v3663_v38 = vld [vmem:[%s5036_s3 + $0x2a0] ss:$16 sps:$4 sm:$0xff]  }
  0x99   :  { %1503 = vmatprep.subr.bf16.mxu1 %v3530_v40  ;;  %v3617_v40 = vld [vmem:[%s5036_s3 + $0x24] ss:$16 sps:$4 sm:$0xff]   ;;  %v3615_v41 = vld [vmem:[%s5036_s3 + $0x20] ss:$16 sps:$4 sm:$0xff]  }
  0x9b   :  { %1467 = vmatpush1.bf16.msra.mxu0 %v3531_v43  ;;  %v3671_v43 = vld [vmem:[%s5036_s3 + $0x284] ss:$16 sps:$4 sm:$0xff]  }
  0x9c   :  { %1504 = vmatpush1.bf16.msra.mxu1 %v3528_v42  ;;  %1468 = vmatprep.subr.bf16.mxu0 %v3539_v45  ;;  %v3669_v42 = vld [vmem:[%s5036_s3 + $0x280] ss:$16 sps:$4 sm:$0xff]  }
  0x9d   :  { %1505 = vmatprep.subr.bf16.mxu1 %v3536_v44  ;;  %v3620_v44 = vld [vmem:[%s5036_s3 + $0x4] ss:$16 sps:$4 sm:$0xff]   ;;  %v3618_v45 = vld [vmem:[%s5036_s3] ss:$16 sps:$4 sm:$0xff]  }
  0x9f   :  { %1469 = vmatpush1.bf16.msra.mxu0 %v3537_v47  ;;  %v3677_v47 = vld [vmem:[%s5036_s3 + $0x264] ss:$16 sps:$4 sm:$0xff]  }
  0xa0   :  { %1506 = vmatpush1.bf16.msra.mxu1 %v3534_v46  ;;  %1470 = vmatprep.subr.bf16.mxu0 %v3545_v49  ;;  %v3675_v46 = vld [vmem:[%s5036_s3 + $0x260] ss:$16 sps:$4 sm:$0xff]  }
  0xa1   :  { %1507 = vmatprep.subr.bf16.mxu1 %v3542_v48  ;;  %v3623_v48 = vld [vmem:[%s5036_s3 + $0x1e4] ss:$16 sps:$4 sm:$0xff]   ;;  %v3621_v49 = vld [vmem:[%s5036_s3 + $0x1e0] ss:$16 sps:$4 sm:$0xff]  }
  0xa3   :  { %1471 = vmatpush2.bf16.msra.mxu0 %v3543_v51  ;;  %v3683_v51 = vld [vmem:[%s5036_s3 + $0x244] ss:$16 sps:$4 sm:$0xff]  }
  0xa4   :  { %1508 = vmatpush1.bf16.msra.mxu1 %v3540_v50  ;;  %1472 = vmatprep.subr.bf16.mxu0 %v3551_v53  ;;  %v3681_v50 = vld [vmem:[%s5036_s3 + $0x240] ss:$16 sps:$4 sm:$0xff]  }
  0xa5   :  { %1509 = vmatprep.subr.bf16.mxu1 %v3548_v52  ;;  %v3626_v52 = vld [vmem:[%s5036_s3 + $0x1c4] ss:$16 sps:$4 sm:$0xff]   ;;  %v3624_v53 = vld [vmem:[%s5036_s3 + $0x1c0] ss:$16 sps:$4 sm:$0xff]  }
  0xa7   :  { %1473 = vmatpush2.bf16.msra.mxu0 %v3549_v56  ;;  %v3689_v56 = vld [vmem:[%s5036_s3 + $0x224] ss:$16 sps:$4 sm:$0xff]  }
  0xa8   :  { %1510 = vmatpush1.bf16.msra.mxu1 %v3546_v54  ;;  %1474 = vmatprep.subr.bf16.mxu0 %v3557_v58  ;;  %v3687_v54 = vld [vmem:[%s5036_s3 + $0x220] ss:$16 sps:$4 sm:$0xff]  }
  0xa9   :  { %1511 = vmatprep.subr.bf16.mxu1 %v3554_v57  ;;  %v3629_v57 = vld [vmem:[%s5036_s3 + $0x1a4] ss:$16 sps:$4 sm:$0xff]   ;;  %v3627_v58 = vld [vmem:[%s5036_s3 + $0x1a0] ss:$16 sps:$4 sm:$0xff]  }
  0xab   :  { %1475 = vmatpush2.bf16.msra.mxu0 %v3555_v60  ;;  %v3695_v60 = vld [vmem:[%s5036_s3 + $0x204] ss:$16 sps:$4 sm:$0xff]  }
  0xac   :  { %1512 = vmatpush2.bf16.msra.mxu1 %v3552_v59  ;;  %1476 = vmatprep.subr.bf16.mxu0 %v3563_v62  ;;  %v3693_v59 = vld [vmem:[%s5036_s3 + $0x200] ss:$16 sps:$4 sm:$0xff]  }
  0xad   :  { %1513 = vmatprep.subr.bf16.mxu1 %v3560_v61  ;;  %v3632_v61 = vld [vmem:[%s5036_s3 + $0x184] ss:$16 sps:$4 sm:$0xff]   ;;  %v3630_v62 = vld [vmem:[%s5036_s3 + $0x180] ss:$16 sps:$4 sm:$0xff]  }
  0xaf   :  { %1477 = vmatpush2.bf16.msra.mxu0 %v3561_v0  ;;  %v3701_v0 = vld [vmem:[%s5036_s3 + $0x3e4] ss:$16 sps:$4 sm:$0xff]  }
  0xb0   :  { %1514 = vmatpush2.bf16.msra.mxu1 %v3558_v63  ;;  %1478 = vmatprep.subr.bf16.mxu0 %v3569_v2  ;;  %v3699_v63 = vld [vmem:[%s5036_s3 + $0x3e0] ss:$16 sps:$4 sm:$0xff]  }
  0xb1   :  { %1515 = vmatprep.subr.bf16.mxu1 %v3566_v1  ;;  %v3635_v1 = vld [vmem:[%s5036_s3 + $0x164] ss:$16 sps:$4 sm:$0xff]   ;;  %v3633_v2 = vld [vmem:[%s5036_s3 + $0x160] ss:$16 sps:$4 sm:$0xff]  }
  0xb3   :  { %1479 = vmatpush2.bf16.msra.mxu0 %v3567_v4  ;;  %v3707_v4 = vld [vmem:[%s5036_s3 + $0x3c4] ss:$16 sps:$4 sm:$0xff]  }
  0xb4   :  { %1516 = vmatpush2.bf16.msra.mxu1 %v3564_v3  ;;  %1480 = vmatprep.subr.bf16.mxu0 %v3575_v6  ;;  %v3705_v3 = vld [vmem:[%s5036_s3 + $0x3c0] ss:$16 sps:$4 sm:$0xff]  }
  0xb5   :  { %1517 = vmatprep.subr.bf16.mxu1 %v3572_v5  ;;  %v3638_v5 = vld [vmem:[%s5036_s3 + $0x144] ss:$16 sps:$4 sm:$0xff]   ;;  %v3636_v6 = vld [vmem:[%s5036_s3 + $0x140] ss:$16 sps:$4 sm:$0xff]  }
  0xb7   :  { %1481 = vmatpush2.bf16.msra.mxu0 %v3573_v10  ;;  %v3713_v10 = vld [vmem:[%s5036_s3 + $0x3a4] ss:$16 sps:$4 sm:$0xff]  }
  0xb8   :  { %1518 = vmatpush2.bf16.msra.mxu1 %v3570_v7  ;;  %1482 = vmatprep.subr.bf16.mxu0 %v3581_v12  ;;  %v3711_v7 = vld [vmem:[%s5036_s3 + $0x3a0] ss:$16 sps:$4 sm:$0xff]  }
  0xb9   :  { %1519 = vmatprep.subr.bf16.mxu1 %v3578_v11  ;;  %v3641_v11 = vld [vmem:[%s5036_s3 + $0x124] ss:$16 sps:$4 sm:$0xff]   ;;  %v3639_v12 = vld [vmem:[%s5036_s3 + $0x120] ss:$16 sps:$4 sm:$0xff]  }
  0xbb   :  { %1483 = vmatpush2.bf16.msra.mxu0 %v3579_v14  ;;  %v3719_v14 = vld [vmem:[%s5036_s3 + $0x384] ss:$16 sps:$4 sm:$0xff]  }
  0xbc   :  { %1520 = vmatpush2.bf16.msra.mxu1 %v3576_v13  ;;  %1484 = vmatprep.subr.bf16.mxu0 %v3587_v17  ;;  %v3717_v13 = vld [vmem:[%s5036_s3 + $0x380] ss:$16 sps:$4 sm:$0xff]  }
  0xbd   :  { %1521 = vmatprep.subr.bf16.mxu1 %v3584_v15  ;;  %v3644_v15 = vld [vmem:[%s5036_s3 + $0x104] ss:$16 sps:$4 sm:$0xff]  }
  0xbf   :  { %1485 = vmatpush2.bf16.msra.mxu0 %v3585_v21  ;;  %v3642_v21 = vld [vmem:[%s5036_s3 + $0x100] ss:$16 sps:$4 sm:$0xff]  }
  0xc0   :  { %1522 = vmatpush2.bf16.msra.mxu1 %v3582_v20  ;;  %1550 = vmatprep.subr.bf16.mxu0 %v3593_v23 }
  0xc1   :  { %1523 = vmatprep.subr.bf16.mxu1 %v3590_v22  ;;  %v3725_v22 = vld [vmem:[%s5036_s3 + $0x364] ss:$16 sps:$4 sm:$0xff]  }
  0xc2   :  { %1487 = vmatmul.mubr.bf16.vlgmr.msra.gmra.mxu0 %v4074_v9  ;;  %v3600_v9 = vld [vmem:[%s5036_s3 + $0xc0] ss:$16 sps:$4 sm:$0xff]  }
  0xc3   :  { %1551 = vmatpush1.bf16.msra.mxu0 %v3591_v25  ;;  %1568 = vmatprep.mubr.bf16.mxu0 %v3821_v16  ;;  %v3605_v16 = vld [vmem:[%s5036_s3 + $0xa4] ss:$16 sps:$4 sm:$0xff]   ;;  %v3647_v25 = vld [vmem:[%s5036_s3 + $0xec] ss:$16 sps:$4 sm:$0xff]  }
  0xc4   :  { %1524 = vmatpush2.bf16.msra.mxu1 %v3588_v24  ;;  %2375 = vmatprep.subr.bf16.mxu0 %v3599_v27 }
  0xc5   :  { %1525 = vmatprep.subr.bf16.mxu1 %v3596_v26  ;;  %v3723_v26 = vld [vmem:[%s5036_s3 + $0x360] ss:$16 sps:$4 sm:$0xff]  }
  0xc8   :  { %1526 = vmatpush2.bf16.msra.mxu1 %v3594_v28 }
  0xc9   :  { %2416 = vmatprep.subr.bf16.mxu1 %v3653_v32 }
  0xca   :  { %3093 = vmatmul.mubr.msk.bf16.vlgmr.msra.gmra.mxu0 %vm1245_vm0, %v4100_v18  ;;  %v3608_v18 = vld [vmem:[%s5036_s3 + $0x84] ss:$16 sps:$4 sm:$0xff]  }
  0xcb   :  { %1528 = vmatmul.mubr.bf16.vlgmr.msra.gmra.mxu1 %v4285_v19  ;;  %2376 = vmatpush1.bf16.msra.mxu0 %v3597_v29  ;;  %v3606_v19 = vld [vmem:[%s5036_s3 + $0x80] ss:$16 sps:$4 sm:$0xff]   ;;  %v3731_v29 = vld [vmem:[%s5036_s3 + $0x344] ss:$16 sps:$4 sm:$0xff]  }
  0xcc   :  { %2377 = vmatprep.subr.bf16.mxu0 %v3602_v30  ;;  %2417 = vmatpush1.bf16.msra.mxu1 %v3651_v31  ;;  %v3735_v31 = vld [vmem:[%s5036_s3 + $0x320] ss:$16 sps:$4 sm:$0xff]  }
  0xcd   :  { %2418 = vmatprep.subr.bf16.mxu1 %v3659_v35  ;;  %v3743_v35 = vld [vmem:[%s5036_s3 + $0x2ec] ss:$16 sps:$4 sm:$0xff]  }
  0xcf   :  { %2378 = vmatpush1.bf16.msra.mxu0 %v3600_v9 }
  0xd0   :  { %2379 = vmatprep.subr.bf16.mxu0 %v3605_v16  ;;  %2419 = vmatpush1.bf16.msra.mxu1 %v3657_v34  ;;  %v3729_v16 = vld [vmem:[%s5036_s3 + $0x340] ss:$16 sps:$4 sm:$0xff]  }
  0xd1   :  { %2420 = vmatprep.subr.bf16.mxu1 %v3665_v39  ;;  %v3738_v34 = vld [vmem:[%s5036_s3 + $0x300] ss:$16 sps:$4 sm:$0xff]  }
  0xd2   :  { %v4704_v39 = vld [vmem:[%s5037_s2] sm:$0xf] }
  0xd3   :  { %2380 = vmatpush1.bf16.msra.mxu0 %v3603_v55 }
  0xd4   :  { %2381 = vmatprep.subr.bf16.mxu0 %v3608_v18  ;;  %2421 = vmatpush1.bf16.msra.mxu1 %v3663_v38  ;;  %v3737_v18 = vld [vmem:[%s5036_s3 + $0x324] ss:$16 sps:$4 sm:$0xff]  }
  0xd5   :  { %2422 = vmatprep.subr.bf16.mxu1 %v3671_v43 }
  0xd7   :  { %2382 = vmatpush1.bf16.msra.mxu0 %v3606_v19 }
  0xd8   :  { %2383 = vmatprep.subr.bf16.mxu0 %v3611_v33  ;;  %2423 = vmatpush1.bf16.msra.mxu1 %v3669_v42  ;;  %v3740_v33 = vld [vmem:[%s5036_s3 + $0x304] ss:$16 sps:$4 sm:$0xff]  }
  0xd9   :  { %2424 = vmatprep.subr.bf16.mxu1 %v3677_v47 }
  0xdb   :  { %2384 = vmatpush1.bf16.msra.mxu0 %v3609_v8 }
  0xdc   :  { %2385 = vmatprep.subr.bf16.mxu0 %v3614_v36  ;;  %2425 = vmatpush1.bf16.msra.mxu1 %v3675_v46  ;;  %v245_v36 = vlaneseq }
  0xdd   :  { %2426 = vmatprep.subr.bf16.mxu1 %v3683_v51 }
  0xdf   :  { %2386 = vmatpush1.bf16.msra.mxu0 %v3612_v37  ;;  %v4698_v37 = vshrl.u32 %v245_v36, 7 }
  0xe0   :  { %2387 = vmatprep.subr.bf16.mxu0 %v3617_v40  ;;  %2427 = vmatpush1.bf16.msra.mxu1 %v3681_v50 }
  0xe1   :  { %2428 = vmatprep.subr.bf16.mxu1 %v3689_v56  ;;  %v247_v38 = vsub.s32 0, %v4698_v37  ;;  %v251_v40 = vsub.s32 1, %v4698_v37 }
  0xe3   :  { %2388 = vmatpush1.bf16.msra.mxu0 %v3615_v41  ;;  %v248_v41 = vrot.slane %v4704_v39, %v247_v38  ;;  %v252_v42 = vrot.slane %v4704_v39, %v251_v40 }
  0xe4   :  { %2389 = vmatprep.subr.bf16.mxu0 %v3620_v44  ;;  %2429 = vmatpush1.bf16.msra.mxu1 %v3687_v54 }
  0xe5   :  { %2430 = vmatprep.subr.bf16.mxu1 %v3695_v60  ;;  %v3645_v60 = vld [vmem:[%s5036_s3 + $0xe8] ss:$16 sps:$4 sm:$0xff]  }
  0xe7   :  { %2390 = vmatpush1.bf16.msra.mxu0 %v3618_v45 }
  0xe8   :  { %2391 = vmatprep.subr.bf16.mxu0 %v3623_v48  ;;  %2431 = vmatpush1.bf16.msra.mxu1 %v3693_v59 }
  0xe9   :  { %2432 = vmatprep.subr.bf16.mxu1 %v3701_v0 }
  0xeb   :  { %2392 = vmatpush2.bf16.msra.mxu0 %v3621_v49 }
  0xec   :  { %2393 = vmatprep.subr.bf16.mxu0 %v3626_v52  ;;  %2433 = vmatpush2.bf16.msra.mxu1 %v3699_v63  ;;  %v3650_v63 = vld [vmem:[%s5036_s3 + $0xcc] ss:$16 sps:$4 sm:$0xff]  }
  0xed   :  { %2434 = vmatprep.subr.bf16.mxu1 %v3707_v4  ;;  %v3654_v4 = vld [vmem:[%s5036_s3 + $0xa8] ss:$16 sps:$4 sm:$0xff]  }
  0xef   :  { %2394 = vmatpush2.bf16.msra.mxu0 %v3624_v53 }
  0xf0   :  { %2395 = vmatprep.subr.bf16.mxu0 %v3629_v57  ;;  %2435 = vmatpush2.bf16.msra.mxu1 %v3705_v3  ;;  %v3656_v3 = vld [vmem:[%s5036_s3 + $0xac] ss:$16 sps:$4 sm:$0xff]  }
  0xf1   :  { %2436 = vmatprep.subr.bf16.mxu1 %v3713_v10  ;;  %v3666_v10 = vld [vmem:[%s5036_s3 + $0x68] ss:$16 sps:$4 sm:$0xff]  }
  0xf3   :  { %2396 = vmatpush2.bf16.msra.mxu0 %v3627_v58 }
  0xf4   :  { %2397 = vmatprep.subr.bf16.mxu0 %v3632_v61  ;;  %2437 = vmatpush2.bf16.msra.mxu1 %v3711_v7  ;;  %v3668_v7 = vld [vmem:[%s5036_s3 + $0x6c] ss:$16 sps:$4 sm:$0xff]  }
  0xf5   :  { %2438 = vmatprep.subr.bf16.mxu1 %v3719_v14  ;;  %v3678_v14 = vld [vmem:[%s5036_s3 + $0x28] ss:$16 sps:$4 sm:$0xff]  }
  0xf7   :  { %2398 = vmatpush2.bf16.msra.mxu0 %v3630_v62 }
  0xf8   :  { %2399 = vmatprep.subr.bf16.mxu0 %v3635_v1  ;;  %2439 = vmatpush2.bf16.msra.mxu1 %v3717_v13  ;;  %v3648_v1 = vld [vmem:[%s5036_s3 + $0xc8] ss:$16 sps:$4 sm:$0xff]   ;;  %v3680_v13 = vld [vmem:[%s5036_s3 + $0x2c] ss:$16 sps:$4 sm:$0xff]  }
  0xf9   :  { %2440 = vmatprep.subr.bf16.mxu1 %v3725_v22  ;;  %v3698_v22 = vld [vmem:[%s5036_s3 + $0x1cc] ss:$16 sps:$4 sm:$0xff]  }
  0xfb   :  { %2400 = vmatpush2.bf16.msra.mxu0 %v3633_v2 }
  0xfc   :  { %2401 = vmatprep.subr.bf16.mxu0 %v3638_v5  ;;  %2441 = vmatpush2.bf16.msra.mxu1 %v3723_v26  ;;  %v3662_v5 = vld [vmem:[%s5036_s3 + $0x8c] ss:$16 sps:$4 sm:$0xff]  }
  0xfd   :  { %2442 = vmatprep.subr.bf16.mxu1 %v3731_v29  ;;  %v3710_v26 = vld [vmem:[%s5036_s3 + $0x18c] ss:$16 sps:$4 sm:$0xff]   ;;  %v3714_v29 = vld [vmem:[%s5036_s3 + $0x168] ss:$16 sps:$4 sm:$0xff]  }
  0xff   :  { %2402 = vmatpush2.bf16.msra.mxu0 %v3636_v6  ;;  %v3660_v6 = vld [vmem:[%s5036_s3 + $0x88] ss:$16 sps:$4 sm:$0xff]  }
 0x100   :  { %2403 = vmatprep.subr.bf16.mxu0 %v3641_v11  ;;  %2443 = vmatpush2.bf16.msra.mxu1 %v3729_v16  ;;  %v3674_v11 = vld [vmem:[%s5036_s3 + $0x4c] ss:$16 sps:$4 sm:$0xff]   ;;  %v3720_v16 = vld [vmem:[%s5036_s3 + $0x148] ss:$16 sps:$4 sm:$0xff]  }
 0x101   :  { %2444 = vmatprep.subr.bf16.mxu1 %v3737_v18  ;;  %v259_v18 = vsub.s32 3, %v4698_v37 }
 0x102   :  { %v1283_v17 = vpop.f32.mrf.mxu0 }
 0x103   :  { %v1324_v20 = vpop.f32.mrf.mxu1  ;;  %2404 = vmatpush2.bf16.msra.mxu0 %v3639_v12  ;;  %v1284_v43 = vadd.f32 %v1283_v17, %v248_v41  ;;  %v3672_v12 = vld [vmem:[%s5036_s3 + $0x48] ss:$16 sps:$4 sm:$0xff]  }
 0x104   :  { %v1285_v23 = vpop.f32.mrf.mxu0  ;;  %2405 = vmatprep.subr.bf16.mxu0 %v3644_v15  ;;  %2445 = vmatpush2.bf16.msra.mxu1 %v3735_v31  ;;  %v3686_v15 = vld [vmem:[%s5036_s3 + $0xc] ss:$16 sps:$4 sm:$0xff]   ;;  %v3684_v17 = vld [vmem:[%s5036_s3 + $0x8] ss:$16 sps:$4 sm:$0xff]  }
 0x105   :  { %v1326_v24 = vpop.f32.mrf.mxu1  ;;  %2446 = vmatprep.subr.bf16.mxu1 %v3740_v33  ;;  %v1286_v44 = vadd.f32 %v1285_v23, %v252_v42  ;;  %v1325_v45 = vadd.f32 %v1324_v20, %v1284_v43  ;;  %v3692_v20 = vld [vmem:[%s5036_s3 + $0x1ec] ss:$16 sps:$4 sm:$0xff]   ;;  %v3696_v23 = vld [vmem:[%s5036_s3 + $0x1c8] ss:$16 sps:$4 sm:$0xff]  }
 0x106   :  { %v1287_v27 = vpop.f32.mrf.mxu0  ;;  %v3732_v41 = vld [vmem:[%s5036_s3 + $0x108] ss:$16 sps:$4 sm:$0xff]  }
 0x107   :  { %v1328_v28 = vpop.f32.mrf.mxu1  ;;  %2406 = vmatpush2.bf16.msra.mxu0 %v3642_v21  ;;  %v1327_v47 = vadd.f32 %v1326_v24, %v1286_v44  ;;  %v3690_v21 = vld [vmem:[%s5036_s3 + $0x1e8] ss:$16 sps:$4 sm:$0xff]   ;;  %v3704_v24 = vld [vmem:[%s5036_s3 + $0x1ac] ss:$16 sps:$4 sm:$0xff]  }
 0x108   :  { %v1288_v30 = vpop.f32.mrf.mxu0  ;;  %2457 = vmatprep.subr.bf16.mxu0 %v3647_v25  ;;  %2447 = vmatpush2.bf16.msra.mxu1 %v3738_v34  ;;  %v3702_v25 = vld [vmem:[%s5036_s3 + $0x1a8] ss:$16 sps:$4 sm:$0xff]   ;;  %v3716_v28 = vld [vmem:[%s5036_s3 + $0x16c] ss:$16 sps:$4 sm:$0xff]   ;;  %v260_v34 = vrot.slane %v4704_v39, %v259_v18 }
 0x109   :  { %v1329_v9 = vpop.f32.mrf.mxu1  ;;  %2498 = vmatprep.subr.bf16.mxu1 %v3743_v35  ;;  %v3708_v27 = vld [vmem:[%s5036_s3 + $0x188] ss:$16 sps:$4 sm:$0xff]   ;;  %v3722_v30 = vld [vmem:[%s5036_s3 + $0x14c] ss:$16 sps:$4 sm:$0xff]  }
 0x10a   :  { %v255_v9 = vsub.s32 2, %v4698_v37 }
 0x10b   :  { %v1406_v55 = vpop.f32.mrf.mxu1 }
 0x10c   :  { %v256_v31 = vrot.slane %v4704_v39, %v255_v9 }
 0x10d   :  { %v1408_v19 = vpop.f32.mrf.mxu1 }
 0x10f   :  { %v1410_v32 = vpop.f32.mrf.mxu1 }
 0x110   :  { %v3726_v32 = vld [vmem:[%s5036_s3 + $0x128] ss:$16 sps:$4 sm:$0xff]  }
 0x111   :  { %v1411_v8 = vpop.f32.mrf.mxu1 }
 0x112   :  { %v3734_v8 = vld [vmem:[%s5036_s3 + $0x10c] ss:$16 sps:$4 sm:$0xff]  }
 0x142   :  { %v1365_v46 = vpop.f32.mrf.mxu0 }
 0x143   :  { %v1366_v48 = vadd.f32 %v1365_v46, %v1325_v45 }
 0x144   :  { %v1367_v49 = vpop.f32.mrf.mxu0 }
 0x145   :  { %v1407_v50 = vadd.f32 %v1406_v55, %v1366_v48  ;;  %v1368_v51 = vadd.f32 %v1367_v49, %v1327_v47  ;;  %v3728_v55 = vld [vmem:[%s5036_s3 + $0x12c] ss:$16 sps:$4 sm:$0xff]  }
 0x146   :  { %v1369_v52 = vpop.f32.mrf.mxu0 }
 0x147   :  { %v1409_v53 = vadd.f32 %v1408_v19, %v1368_v51  ;;  %v1577_v54 = vmax.f32 %v1407_v50, 0.0 }
 0x148   :  { %v1370_v56 = vpop.f32.mrf.mxu0 }
 0x149   :  { %v1578_v57 = vmax.f32 %v1409_v53, 0.0  ;;  %v4718_v61 = vpack.c.bf16 %v1577_v54, %v1577_v54 }
 0x14b   :  { %v4713_v58 = vpop.f32.mrf.mxu1  ;;  %v1582_v59 = vpack.c.bf16 %v1578_v57, %v1578_v57 }
 0x14c   :  { %v1448_v36 = vadd.f32 %v4713_v58, %v256_v31  ;;  %v3779_v31 = vld [vmem:[%s5036_s3 + $0x36c] ss:$16 sps:$4 sm:$0xff]  }
 0x14d   :  { %v4720_v62 = vpop.f32.mrf.mxu1  ;;  %2407 = vmatprep.mubr.bf16.mxu0 %v1582_v59 }
 0x14e   :  { %2408 = vmatmul.mubr.bf16.vlgmr.msra.gmra.mxu0 %v4718_v61  ;;  %v1450_v43 = vadd.f32 %v4720_v62, %v260_v34  ;;  %v3741_v62 = vld [vmem:[%s5036_s3 + $0x2e8] ss:$16 sps:$4 sm:$0xff]   ;;  %v3785_v34 = vld [vmem:[%s5036_s3 + $0x32c] ss:$16 sps:$4 sm:$0xff]  }
 0x14f   :  { %v1451_v0 = vpop.f32.mrf.mxu1  ;;  %2458 = vmatpush1.bf16.msra.mxu0 %v3645_v60  ;;  %2489 = vmatprep.mubr.bf16.mxu0 %v1582_v59 }
 0x150   :  { %2459 = vmatprep.subr.bf16.mxu0 %v3650_v63  ;;  %v3746_v0 = vld [vmem:[%s5036_s3 + $0x2cc] ss:$16 sps:$4 sm:$0xff]  }
 0x151   :  { %v1452_v2 = vpop.f32.mrf.mxu1 }
 0x152   :  { %v3790_v2 = vld [vmem:[%s5038_s5 + $0x38] sm:$0xff]  }
 0x153   :  { %2460 = vmatpush1.bf16.msra.mxu0 %v3648_v1  ;;  %v3789_v1 = vld [vmem:[%s5038_s5 + $0x78] sm:$0xff]  }
 0x154   :  { %2461 = vmatprep.subr.bf16.mxu0 %v3656_v3  ;;  %v3791_v3 = vld [vmem:[%s5038_s5 + $0x70] sm:$0xff]  }
 0x157   :  { %2462 = vmatpush1.bf16.msra.mxu0 %v3654_v4  ;;  %v3749_v4 = vld [vmem:[%s5036_s3 + $0x2ac] ss:$16 sps:$4 sm:$0xff]  }
 0x158   :  { %2463 = vmatprep.subr.bf16.mxu0 %v3662_v5  ;;  %v3747_v5 = vld [vmem:[%s5036_s3 + $0x2a8] ss:$16 sps:$4 sm:$0xff]  }
 0x15b   :  { %2464 = vmatpush1.bf16.msra.mxu0 %v3660_v6  ;;  %v3792_v6 = vld [vmem:[%s5038_s5 + $0x30] sm:$0xff]  }
 0x15c   :  { %2465 = vmatprep.subr.bf16.mxu0 %v3668_v7  ;;  %v3752_v7 = vld [vmem:[%s5036_s3 + $0x28c] ss:$16 sps:$4 sm:$0xff]  }
 0x15f   :  { %2466 = vmatpush1.bf16.msra.mxu0 %v3666_v10  ;;  %v3793_v10 = vld [vmem:[%s5038_s5 + $0x68] sm:$0xff]  }
 0x160   :  { %2467 = vmatprep.subr.bf16.mxu0 %v3674_v11  ;;  %v3794_v11 = vld [vmem:[%s5038_s5 + $0x28] sm:$0xff]  }
 0x163   :  { %2468 = vmatpush1.bf16.msra.mxu0 %v3672_v12  ;;  %v3795_v12 = vld [vmem:[%s5038_s5 + $0x60] sm:$0xff]  }
 0x164   :  { %2469 = vmatprep.subr.bf16.mxu0 %v3680_v13  ;;  %v3750_v13 = vld [vmem:[%s5036_s3 + $0x288] ss:$16 sps:$4 sm:$0xff]  }
 0x167   :  { %2470 = vmatpush1.bf16.msra.mxu0 %v3678_v14  ;;  %v3755_v14 = vld [vmem:[%s5036_s3 + $0x26c] ss:$16 sps:$4 sm:$0xff]  }
 0x168   :  { %2471 = vmatprep.subr.bf16.mxu0 %v3686_v15  ;;  %v3796_v15 = vld [vmem:[%s5038_s5 + $0x20] sm:$0xff]  }
 0x16b   :  { %2472 = vmatpush1.bf16.msra.mxu0 %v3684_v17  ;;  %v3753_v17 = vld [vmem:[%s5036_s3 + $0x268] ss:$16 sps:$4 sm:$0xff]  }
 0x16c   :  { %2473 = vmatprep.subr.bf16.mxu0 %v3692_v20  ;;  %v3758_v20 = vld [vmem:[%s5036_s3 + $0x24c] ss:$16 sps:$4 sm:$0xff]  }
 0x16f   :  { %2474 = vmatpush2.bf16.msra.mxu0 %v3690_v21  ;;  %v3756_v21 = vld [vmem:[%s5036_s3 + $0x248] ss:$16 sps:$4 sm:$0xff]  }
 0x170   :  { %2475 = vmatprep.subr.bf16.mxu0 %v3698_v22  ;;  %v3761_v22 = vld [vmem:[%s5036_s3 + $0x22c] ss:$16 sps:$4 sm:$0xff]  }
 0x173   :  { %2476 = vmatpush2.bf16.msra.mxu0 %v3696_v23  ;;  %v3759_v23 = vld [vmem:[%s5036_s3 + $0x228] ss:$16 sps:$4 sm:$0xff]  }
 0x174   :  { %2477 = vmatprep.subr.bf16.mxu0 %v3704_v24  ;;  %v3764_v24 = vld [vmem:[%s5036_s3 + $0x20c] ss:$16 sps:$4 sm:$0xff]  }
 0x177   :  { %2478 = vmatpush2.bf16.msra.mxu0 %v3702_v25  ;;  %v3762_v25 = vld [vmem:[%s5036_s3 + $0x208] ss:$16 sps:$4 sm:$0xff]  }
 0x178   :  { %2479 = vmatprep.subr.bf16.mxu0 %v3710_v26  ;;  %v3767_v26 = vld [vmem:[%s5036_s3 + $0x3ec] ss:$16 sps:$4 sm:$0xff]  }
 0x17b   :  { %2480 = vmatpush2.bf16.msra.mxu0 %v3708_v27  ;;  %v3765_v27 = vld [vmem:[%s5036_s3 + $0x3e8] ss:$16 sps:$4 sm:$0xff]  }
 0x17c   :  { %2481 = vmatprep.subr.bf16.mxu0 %v3716_v28  ;;  %v3770_v28 = vld [vmem:[%s5036_s3 + $0x3cc] ss:$16 sps:$4 sm:$0xff]  }
 0x17f   :  { %2482 = vmatpush2.bf16.msra.mxu0 %v3714_v29  ;;  %v3768_v29 = vld [vmem:[%s5036_s3 + $0x3c8] ss:$16 sps:$4 sm:$0xff]  }
 0x180   :  { %2483 = vmatprep.subr.bf16.mxu0 %v3722_v30  ;;  %v3773_v30 = vld [vmem:[%s5036_s3 + $0x3ac] ss:$16 sps:$4 sm:$0xff]  }
 0x182   :  { %v1488_v19 = vpop.f32.mrf.mxu0 }
 0x183   :  { %2484 = vmatpush2.bf16.msra.mxu0 %v3720_v16  ;;  %v1489_v44 = vadd.f32 %v1488_v19, %v1448_v36  ;;  %v3771_v16 = vld [vmem:[%s5036_s3 + $0x3a8] ss:$16 sps:$4 sm:$0xff]   ;;  %v3788_v36 = vld [vmem:[%s5036_s3 + $0x30c] ss:$16 sps:$4 sm:$0xff]  }
 0x184   :  { %v1490_v33 = vpop.f32.mrf.mxu0  ;;  %2485 = vmatprep.subr.bf16.mxu0 %v3728_v55  ;;  %v3776_v55 = vld [vmem:[%s5036_s3 + $0x38c] ss:$16 sps:$4 sm:$0xff]   ;;  %v3774_v19 = vld [vmem:[%s5036_s3 + $0x388] ss:$16 sps:$4 sm:$0xff]  }
 0x185   :  { %v1491_v47 = vadd.f32 %v1490_v33, %v1450_v43  ;;  %v3782_v33 = vld [vmem:[%s5036_s3 + $0x34c] ss:$16 sps:$4 sm:$0xff]  }
 0x186   :  { %v1492_v35 = vpop.f32.mrf.mxu0  ;;  %v3798_v43 = vld [vmem:[%s5038_s5 + $0x18] sm:$0xff]  }
 0x187   :  { %2486 = vmatpush2.bf16.msra.mxu0 %v3726_v32  ;;  %v3777_v32 = vld [vmem:[%s5036_s3 + $0x368] ss:$16 sps:$4 sm:$0xff]  }
 0x188   :  { %v1493_v42 = vpop.f32.mrf.mxu0  ;;  %2487 = vmatprep.subr.bf16.mxu0 %v3734_v8  ;;  %v3780_v8 = vld [vmem:[%s5036_s3 + $0x348] ss:$16 sps:$4 sm:$0xff]  }
 0x189   :  { %v3783_v35 = vld [vmem:[%s5036_s3 + $0x328] ss:$16 sps:$4 sm:$0xff]  }
 0x18a   :  { %v1570_v46 = vpop.f32.mrf.mxu0  ;;  %v3797_v42 = vld [vmem:[%s5038_s5 + $0x58] sm:$0xff]  }
 0x18b   :  { %v1529_v45 = vpop.f32.mrf.mxu1  ;;  %2488 = vmatpush2.bf16.msra.mxu0 %v3732_v41  ;;  %v3786_v41 = vld [vmem:[%s5036_s3 + $0x308] ss:$16 sps:$4 sm:$0xff]  }
 0x18c   :  { %v1530_v48 = vadd.f32 %v1529_v45, %v1489_v44  ;;  %v1572_v39 = vpop.f32.mrf.mxu0  ;;  %3255 = vmatprep.subr.bf16.mxu0 %v3789_v1  ;;  %v3799_v44 = vld [vmem:[%s5038_s5 + $0x50] sm:$0xff]  }
 0x18d   :  { %v1531_v49 = vpop.f32.mrf.mxu1  ;;  %v3800_v45 = vld [vmem:[%s5038_s5 + $0x10] sm:$0xff]  }
 0x18e   :  { %v1571_v50 = vadd.f32 %v1570_v46, %v1530_v48  ;;  %v1532_v51 = vadd.f32 %v1531_v49, %v1491_v47  ;;  %2490 = vmatmul.mubr.bf16.vlgmr.msra.gmra.mxu0 %v4718_v61  ;;  %v1574_v53 = vpop.f32.mrf.mxu0  ;;  %v3744_v61 = vld [vmem:[%s5036_s3 + $0x2c8] ss:$16 sps:$4 sm:$0xff]   ;;  %v3803_v48 = vld [vmem:[%s5038_s5 + $0x40] sm:$0xff]  }
 0x18f   :  { %v1533_v52 = vpop.f32.mrf.mxu1  ;;  %3256 = vmatpush3.bf16.msra.mxu0 %v3790_v2  ;;  %v3801_v46 = vld [vmem:[%s5038_s5 + $0x48] sm:$0xff]   ;;  %v3804_v49 = vld [vmem:[%s5038_s5] sm:$0xff]  }
 0x190   :  { %v1573_v54 = vadd.f32 %v1572_v39, %v1532_v51  ;;  %v1579_v56 = vmax.f32 %v1571_v50, 0.0  ;;  %v1575_v58 = vpop.f32.mrf.mxu0  ;;  %3257 = vmatprep.subr.bf16.mxu0 %v3791_v3  ;;  %v3802_v47 = vld [vmem:[%s5038_s5 + $0x8] sm:$0xff]   ;;  %v3805_v39 = vld [vmem:[%s5038_s5 + $0xf8] sm:$0xff]   ;;  %v3807_v51 = vld [vmem:[%s5038_s5 + $0xf0] sm:$0xff]  }
 0x191   :  { %v1534_v57 = vpop.f32.mrf.mxu1  ;;  %v3806_v50 = vld [vmem:[%s5038_s5 + $0xb8] sm:$0xff]   ;;  %v3808_v52 = vld [vmem:[%s5038_s5 + $0xb0] sm:$0xff]   ;;  %v3809_v53 = vld [vmem:[%s5038_s5 + $0xe8] sm:$0xff]  }
 0x192   :  { %v1580_v59 = vmax.f32 %v1573_v54, 0.0  ;;  %v4827_v63 = vpack.c.bf16 %v1579_v56, %v1579_v56  ;;  %v3810_v54 = vld [vmem:[%s5038_s5 + $0xa8] sm:$0xff]   ;;  %v3811_v56 = vld [vmem:[%s5038_s5 + $0xe0] sm:$0xff]   ;;  %v3813_v58 = vld [vmem:[%s5038_s5 + $0xd8] sm:$0xff]  }
 0x193   :  { %3258 = vmatpush3.bf16.msra.mxu0 %v3792_v6  ;;  %v3812_v57 = vld [vmem:[%s5038_s5 + $0xa0] sm:$0xff]   ;;  %v3817_v2 = vld [vmem:[%s5038_s5 + $0xc8] sm:$0xff]  }
 0x194   :  { %v1584_v60 = vpack.c.bf16 %v1580_v59, %v1580_v59  ;;  %3259 = vmatprep.subr.bf16.mxu0 %v3793_v10  ;;  %v3814_v59 = vld [vmem:[%s5038_s5 + $0x98] sm:$0xff]   ;;  %v3818_v3 = vld [vmem:[%s5038_s5 + $0x88] sm:$0xff]   ;;  %v1713_v6 = vld [vmem:[%s5039_s4] sm:$0xf] }
 0x196   :  { %2448 = vmatprep.mubr.bf16.mxu1 %v1584_v60 }
 0x197   :  { %2449 = vmatmul.mubr.bf16.vlgmr.msra.gmra.mxu1 %v4827_v63  ;;  %3260 = vmatpush3.bf16.msra.mxu0 %v3794_v11  ;;  %v1718_v11 = vrot.slane %v1713_v6, %v247_v38  ;;  %v1726_v38 = vrot.slane %v1713_v6, %v255_v9 }
 0x198   :  { %2499 = vmatpush1.bf16.msra.mxu1 %v3741_v62  ;;  %2530 = vmatprep.mubr.bf16.mxu1 %v1584_v60  ;;  %v3815_v60 = vld [vmem:[%s5038_s5 + $0xd0] sm:$0xff]  }
 0x199   :  { %2500 = vmatprep.subr.bf16.mxu1 %v3746_v0  ;;  %3261 = vmatprep.subr.bf16.mxu0 %v3795_v12  ;;  %v3816_v62 = vld [vmem:[%s5038_s5 + $0x90] sm:$0xff]  }
 0x19b   :  { %3262 = vmatpush3.bf16.msra.mxu0 %v3796_v15 }
 0x19c   :  { %2501 = vmatpush1.bf16.msra.mxu1 %v3744_v61  ;;  %3263 = vmatprep.subr.bf16.mxu0 %v3797_v42 }
 0x19d   :  { %2502 = vmatprep.subr.bf16.mxu1 %v3749_v4  ;;  %v3819_v4 = vld [vmem:[%s5038_s5 + $0xc0] sm:$0xff]  }
 0x19f   :  { %3264 = vmatpush3.bf16.msra.mxu0 %v3798_v43 }
 0x1a0   :  { %2503 = vmatpush1.bf16.msra.mxu1 %v3747_v5  ;;  %3265 = vmatprep.subr.bf16.mxu0 %v3799_v44  ;;  %v3820_v5 = vld [vmem:[%s5038_s5 + $0x80] sm:$0xff]  }
 0x1a1   :  { %2504 = vmatprep.subr.bf16.mxu1 %v3752_v7 }
 0x1a3   :  { %3266 = vmatpush3.bf16.msra.mxu0 %v3800_v45 }
 0x1a4   :  { %2505 = vmatpush1.bf16.msra.mxu1 %v3750_v13  ;;  %3267 = vmatprep.subr.bf16.mxu0 %v3801_v46  ;;  %v1722_v13 = vrot.slane %v1713_v6, %v251_v40  ;;  %v1730_v40 = vrot.slane %v1713_v6, %v259_v18  ;;  %v3222_v18 = vld [vmem:[%s5040_s6] ss:$0 sm:$0xff] }
 0x1a5   :  { %2506 = vmatprep.subr.bf16.mxu1 %v3755_v14 }
 0x1a7   :  { %3268 = vmatpush3.bf16.msra.mxu0 %v3802_v47 }
 0x1a8   :  { %2507 = vmatpush1.bf16.msra.mxu1 %v3753_v17  ;;  %3269 = vmatprep.subr.bf16.mxu0 %v3803_v48 }
 0x1a9   :  { %2508 = vmatprep.subr.bf16.mxu1 %v3758_v20 }
 0x1ab   :  { %3270 = vmatpush3.bf16.msra.mxu0 %v3804_v49 }
 0x1ac   :  { %2509 = vmatpush1.bf16.msra.mxu1 %v3756_v21 }
 0x1ad   :  { %2510 = vmatprep.subr.bf16.mxu1 %v3761_v22 }
 0x1b0   :  { %2511 = vmatpush1.bf16.msra.mxu1 %v3759_v23 }
 0x1b1   :  { %2512 = vmatprep.subr.bf16.mxu1 %v3764_v24 }
 0x1b4   :  { %2513 = vmatpush1.bf16.msra.mxu1 %v3762_v25 }
 0x1b5   :  { %2514 = vmatprep.subr.bf16.mxu1 %v3767_v26 }
 0x1b8   :  { %2515 = vmatpush2.bf16.msra.mxu1 %v3765_v27 }
 0x1b9   :  { %2516 = vmatprep.subr.bf16.mxu1 %v3770_v28 }
 0x1bc   :  { %2517 = vmatpush2.bf16.msra.mxu1 %v3768_v29 }
 0x1bd   :  { %2518 = vmatprep.subr.bf16.mxu1 %v3773_v30 }
 0x1c0   :  { %2519 = vmatpush2.bf16.msra.mxu1 %v3771_v16 }
 0x1c1   :  { %2520 = vmatprep.subr.bf16.mxu1 %v3776_v55 }
 0x1c4   :  { %2521 = vmatpush2.bf16.msra.mxu1 %v3774_v19 }
 0x1c5   :  { %2522 = vmatprep.subr.bf16.mxu1 %v3779_v31 }
 0x1c8   :  { %2523 = vmatpush2.bf16.msra.mxu1 %v3777_v32 }
 0x1c9   :  { %2524 = vmatprep.subr.bf16.mxu1 %v3782_v33 }
 0x1cc   :  { %2525 = vmatpush2.bf16.msra.mxu1 %v3780_v8 }
 0x1cd   :  { %2526 = vmatprep.subr.bf16.mxu1 %v3785_v34 }
 0x1d0   :  { %2527 = vmatpush2.bf16.msra.mxu1 %v3783_v35 }
 0x1d1   :  { %2528 = vmatprep.subr.bf16.mxu1 %v3788_v36 }
 0x1d4   :  { %2529 = vmatpush2.bf16.msra.mxu1 %v3786_v41 }
 0x1d5   :  { %3277 = vmatprep.subr.bf16.mxu1 %v3805_v39 }
 0x1d7   :  { %2531 = vmatmul.mubr.bf16.vlgmr.msra.gmra.mxu1 %v4827_v63 }
 0x1d8   :  { %3278 = vmatpush3.bf16.msra.mxu1 %v3806_v50 }
 0x1d9   :  { %3279 = vmatprep.subr.bf16.mxu1 %v3807_v51 }
 0x1dc   :  { %3280 = vmatpush3.bf16.msra.mxu1 %v3808_v52 }
 0x1dd   :  { %3281 = vmatprep.subr.bf16.mxu1 %v3809_v53 }
 0x1e0   :  { %3282 = vmatpush3.bf16.msra.mxu1 %v3810_v54 }
 0x1e1   :  { %3283 = vmatprep.subr.bf16.mxu1 %v3811_v56 }
 0x1e4   :  { %3284 = vmatpush3.bf16.msra.mxu1 %v3812_v57 }
 0x1e5   :  { %3285 = vmatprep.subr.bf16.mxu1 %v3813_v58 }
 0x1e8   :  { %3286 = vmatpush3.bf16.msra.mxu1 %v3814_v59 }
 0x1e9   :  { %3287 = vmatprep.subr.bf16.mxu1 %v3815_v60 }
 0x1ec   :  { %3288 = vmatpush3.bf16.msra.mxu1 %v3816_v62 }
 0x1ed   :  { %3289 = vmatprep.subr.bf16.mxu1 %v3817_v2 }
 0x1f0   :  { %3290 = vmatpush3.bf16.msra.mxu1 %v3818_v3 }
 0x1f1   :  { %3291 = vmatprep.subr.bf16.mxu1 %v3819_v4 }
 0x1f4   :  { %3292 = vmatpush3.bf16.msra.mxu1 %v3820_v5 }
 0x20e   :  { %v2409_v63 = vpop.f32.mrf.mxu0 }
 0x20f   :  { %v2410_v15 = vadd.f32 %v2409_v63, %v1718_v11 }
 0x210   :  { %v2411_v0 = vpop.f32.mrf.mxu0 }
 0x211   :  { %v2412_v20 = vadd.f32 %v2411_v0, %v1722_v13 }
 0x212   :  { %v2413_v61 = vpop.f32.mrf.mxu0 }
 0x214   :  { %v2414_v1 = vpop.f32.mrf.mxu0 }
 0x24e   :  { %v2491_v7 = vpop.f32.mrf.mxu0 }
 0x24f   :  { %v2492_v30 = vadd.f32 %v2491_v7, %v1726_v38 }
 0x250   :  { %v2493_v10 = vpop.f32.mrf.mxu0 }
 0x251   :  { %v2494_v55 = vadd.f32 %v2493_v10, %v1730_v40 }
 0x252   :  { %v2495_v12 = vpop.f32.mrf.mxu0 }
 0x254   :  { %v2496_v14 = vpop.f32.mrf.mxu0 }
 0x257   :  { %v2450_v17 = vpop.f32.mrf.mxu1 }
 0x258   :  { %v2451_v21 = vadd.f32 %v2450_v17, %v2410_v15 }
 0x259   :  { %v2452_v22 = vpop.f32.mrf.mxu1 }
 0x25a   :  { %v2453_v23 = vadd.f32 %v2452_v22, %v2412_v20  ;;  %v2539_v24 = vmax.f32 %v2451_v21, 0.0 }
 0x25b   :  { %v2454_v25 = vpop.f32.mrf.mxu1 }
 0x25c   :  { %v2540_v26 = vmax.f32 %v2453_v23, 0.0  ;;  %v2543_v29 = vpack.c.bf16 %v2539_v24, %v2539_v24 }
 0x25d   :  { %v2455_v27 = vpop.f32.mrf.mxu1 }
 0x25e   :  { %v2544_v28 = vpack.c.bf16 %v2540_v26, %v2540_v26 }
 0x260   :  { %2842 = vmatprep.mubr.bf16.mxu0 %v2544_v28 }
 0x261   :  { %2843 = vmatmul.mubr.bf16.vlgmr.msra.gmra.mxu0 %v2543_v29 }
 0x297   :  { %v2532_v16 = vpop.f32.mrf.mxu1 }
 0x298   :  { %v2533_v19 = vadd.f32 %v2532_v16, %v2492_v30 }
 0x299   :  { %v2534_v31 = vpop.f32.mrf.mxu1 }
 0x29a   :  { %v2535_v32 = vadd.f32 %v2534_v31, %v2494_v55  ;;  %v2541_v33 = vmax.f32 %v2533_v19, 0.0 }
 0x29b   :  { %v2536_v8 = vpop.f32.mrf.mxu1 }
 0x29c   :  { %v2542_v34 = vmax.f32 %v2535_v32, 0.0  ;;  %v2545_v41 = vpack.c.bf16 %v2541_v33, %v2541_v33 }
 0x29d   :  { %v2537_v35 = vpop.f32.mrf.mxu1 }
 0x29e   :  { %v2546_v36 = vpack.c.bf16 %v2542_v34, %v2542_v34 }
 0x2a0   :  { %2882 = vmatprep.mubr.bf16.mxu1 %v2546_v36 }
 0x2a1   :  { %2883 = vmatmul.mubr.bf16.vlgmr.msra.gmra.mxu1 %v2545_v41 }
 0x321   :  { %v3271_v42 = vpop.f32.mrf.mxu0 }
 0x323   :  { %v3272_v43 = vpop.f32.mrf.mxu0 }
 0x324   :  { %v3273_v37 = vadd.f32 %v3272_v43, %v3271_v42 }
 0x325   :  { %v3274_v9 = vpop.f32.mrf.mxu0 }
 0x326   :  { %v2845_v47 = vadd.f32 %v3273_v37, %v3222_v18 }
 0x327   :  { %v3275_v44 = vpop.f32.mrf.mxu0 }
 0x361   :  { %v3293_v45 = vpop.f32.mrf.mxu1 }
 0x363   :  { %v3294_v46 = vpop.f32.mrf.mxu1 }
 0x364   :  { %v3295_v48 = vadd.f32 %v3294_v46, %v3293_v45 }
 0x365   :  { %v3296_v49 = vpop.f32.mrf.mxu1 }
 0x366   :  { %v2885_v39 = vadd.f32 %v3295_v48, %v2845_v47 }
 0x367   :  { %v3297_v50 = vpop.f32.mrf.mxu1 }
 0x368   :  { %v2890_v51 = vpack.c.bf16 %v2885_v39, %v2885_v39 }
 0x36a   :  { %2891 = vst [vmem:[%s5041_s7] sm:$0x3] %v2890_v51 }

</bundles_post_ra>
